<compile_context>
chip_gen: v7x
topology: tpu7x:2x2x1
jax: 0.10.0
libtpu: 0.0.40
codegen_flags: <defaults>
</compile_context>

<pallas_src>
import jax
import jax.numpy as jnp
from jax import lax
from jax.experimental import pallas as pl
from jax.experimental.pallas import tpu as pltpu

VOCAB = 2000
J = 19
VOCAB_PAD = 2048   # vocab padded to a multiple of 128 (lane axis of the counts block)
LANES = 128        # lane-dense output width (column 0 holds the real scalar)
TB_MAX = 128       # samples per grid step (multiple of 8)


def _round_up(x, m):
    return (x + m - 1) // m * m


def _make_kernel(n, tb):
    inv_count = 1.0 / float(n * J)   # static: mean over n*J embedding elements

    def kernel(ids_ref, colsum_ref, out_ref):
        # ids_ref:    VMEM (tb, n)            int32 — movie ids for tb samples
        # colsum_ref: VMEM (VOCAB_PAD, LANES) f32   — per-vocab sum_j table[v, j],
        #             replicated across 128 lanes; constant index_map => resident.
        # out_ref:    VMEM (tb, LANES)        f32   — per-sample sigmoid, lane-broadcast
        ids = ids_ref[...]                                               # (tb, n)
        vocab_iota = lax.broadcasted_iota(jnp.int32, (1, VOCAB_PAD), 1)  # (1, VOCAB_PAD)

        # counts[b, v] = #{k : ids[b, k] == v}, built with n vectorized compares (VPU).
        counts = jnp.zeros((tb, VOCAB_PAD), jnp.float32)
        for k in range(n):                                  # n is small and static
            counts = counts + (ids[:, k:k + 1] == vocab_iota).astype(jnp.float32)

        # 2048-deep contraction on the MXU.  The lane-replicated RHS makes the
        # result the (tb, LANES) lane-broadcast scalar slab directly.
        acc = jnp.dot(counts, colsum_ref[...],
                      preferred_element_type=jnp.float32)               # (tb, LANES)

        mean = acc * inv_count
        out_ref[...] = pl.reciprocal(1.0 + jnp.exp(-mean), approx=False)  # sigmoid

    return kernel


def prepare_embedding_sum(table):
    """Precompute the lane-replicated per-vocab column sum.

    Build this ONCE per weight set (cache it); it is independent of the inputs.
    table: (VOCAB, J) float.  Returns (VOCAB_PAD, LANES) f32.
    """
    col = jnp.sum(jnp.asarray(table, jnp.float32), axis=1)   # (VOCAB,)
    col = jnp.pad(col, (0, VOCAB_PAD - VOCAB))               # zero-padded vocab
    return jnp.tile(col[:, None], (1, LANES))                # replicate across lanes


def _embedding_sum_batched(movies_batch, colsum_rep):
    """movies_batch: (B, n) int ids; colsum_rep: prepare_embedding_sum(table). -> (B,) f32."""
    movies_batch = jnp.asarray(movies_batch, dtype=jnp.int32)
    b, n = movies_batch.shape
    if n == 0:
        # torch: mean over an empty lookup is NaN
        return jnp.full((b,), jnp.nan, dtype=jnp.float32)

    tb = min(TB_MAX, _round_up(b, 8))          # batch tile, multiple of 8
    b_pad = _round_up(b, tb)
    ids = jnp.zeros((b_pad, n), jnp.int32).at[:b, :].set(movies_batch)  # pad rows with id 0

    out = pl.pallas_call(
        _make_kernel(n, tb),
        out_shape=jax.ShapeDtypeStruct((b_pad, LANES), jnp.float32),
        grid_spec=pltpu.PrefetchScalarGridSpec(
            num_scalar_prefetch=0,
            grid=(b_pad // tb,),
            in_specs=[
                pl.BlockSpec((tb, n), lambda i: (i, 0)),              # ids tile
                pl.BlockSpec((VOCAB_PAD, LANES), lambda i: (0, 0)),   # resident col_sum
            ],
            out_specs=pl.BlockSpec((tb, LANES), lambda i: (i, 0)),    # lane-dense output
        ),
        compiler_params=pltpu.CompilerParams(
            dimension_semantics=("parallel",)),                       # 2 TCs on v7x
    )(ids, colsum_rep)
    return out[:b, 0]


def embedding_sum_forward(movies, colsum_rep):
    """Single sample: movies (n,) int ids. Returns 0-d f32."""
    movies = jnp.asarray(movies, dtype=jnp.int32)
    return _embedding_sum_batched(movies[None, :], colsum_rep)[0]


def embedding_sum_forward_all(movies_batch, colsum_rep):
    """forward_all: (B, n) ids -> stacked per-sample scalars (squeezed), one kernel call."""
    return jnp.squeeze(_embedding_sum_batched(movies_batch, colsum_rep))


if __name__ == "__main__":
    key = jax.random.PRNGKey(0)
    k_w, k_ids, k_ids2 = jax.random.split(key, 3)

    # nn.Embedding default init: N(0, 1)
    table = jax.random.normal(k_w, (VOCAB, J), dtype=jnp.float32)

    # Precompute once per weight set (cached / reused across all calls below).
    colsum_rep = prepare_embedding_sum(table)

    # small deterministic input: batch of 4 samples, 8 movie ids each
    B, N = 4, 8
    movies_batch = jax.random.randint(k_ids, (B, N), 0, VOCAB, dtype=jnp.int32)

    # batched path (forward_all) — single pallas_call over the whole batch
    out_all = jax.block_until_ready(embedding_sum_forward_all(movies_batch, colsum_rep))
    ref_all = jax.nn.sigmoid(jnp.mean(table[movies_batch], axis=(1, 2)))
    assert out_all.shape == (B,), out_all.shape
    assert jnp.allclose(out_all, ref_all, atol=1e-5, rtol=1e-5), (out_all, ref_all)

    # a batch that is not a multiple of 8 (exercises padding + discard)
    B2 = 20
    movies_batch2 = jax.random.randint(k_ids2, (B2, N), 0, VOCAB, dtype=jnp.int32)
    out_all2 = jax.block_until_ready(embedding_sum_forward_all(movies_batch2, colsum_rep))
    ref_all2 = jax.nn.sigmoid(jnp.mean(table[movies_batch2], axis=(1, 2)))
    assert out_all2.shape == (B2,), out_all2.shape
    assert jnp.allclose(out_all2, ref_all2, atol=1e-5, rtol=1e-5), (out_all2, ref_all2)

    # single-sample path (forward)
    out_one = jax.block_until_ready(embedding_sum_forward(movies_batch[0], colsum_rep))
    ref_one = jax.nn.sigmoid(jnp.mean(table[movies_batch[0]]))
    assert jnp.allclose(out_one, ref_one, atol=1e-5, rtol=1e-5), (out_one, ref_one)

    print("KERNEL_OK")
</pallas_src>

<mosaic_0001>
module attributes {stable_mosaic.version = 11 : i64} {
  func.func @kernel(%arg0: i32, %arg1: memref<8x8xi32, #tpu.memory_space<vmem>>, %arg2: memref<2048x128xf32, #tpu.memory_space<vmem>>, %arg3: memref<8x128xf32, #tpu.memory_space<vmem>>) attributes {dimension_semantics = [#tpu.dimension_semantics<parallel>], iteration_bounds = array<i64: 1>, scalar_prefetch = 0 : i64, scratch_operands = 0 : i64, tpu.core_type = #tpu.core_type<tc>, window_params = [{transform_indices = @transform_0, window_bounds = array<i64: 8, 8>}, {pipeline_mode = #tpu.pipeline_mode<synchronous>, transform_indices = @transform_1, window_bounds = array<i64: 2048, 128>}, {transform_indices = @transform_2, window_bounds = array<i64: 8, 128>}]} {
    %c0 = arith.constant 0 : index
    %c0_0 = arith.constant 0 : index
    %0 = vector.load %arg1[%c0, %c0_0] : memref<8x8xi32, #tpu.memory_space<vmem>>, vector<8x8xi32>
    %1 = tpu.iota {dimensions = array<i32: 1>} : vector<1x2048xi32>
    %cst = arith.constant 0.000000e+00 : f32
    %2 = vector.broadcast %cst : f32 to vector<8x2048xf32>
    %3 = vector.extract_strided_slice %0 {offsets = [0, 0], sizes = [8, 1], strides = [1, 1]} : vector<8x8xi32> to vector<8x1xi32>
    %4 = vector.broadcast %3 : vector<8x1xi32> to vector<8x2048xi32>
    %5 = vector.broadcast %1 : vector<1x2048xi32> to vector<8x2048xi32>
    %6 = arith.cmpi eq, %4, %5 : vector<8x2048xi32>
    %7 = arith.extui %6 : vector<8x2048xi1> to vector<8x2048xi32>
    %8 = arith.sitofp %7 : vector<8x2048xi32> to vector<8x2048xf32>
    %9 = arith.addf %2, %8 : vector<8x2048xf32>
    %10 = vector.extract_strided_slice %0 {offsets = [0, 1], sizes = [8, 1], strides = [1, 1]} : vector<8x8xi32> to vector<8x1xi32>
    %11 = vector.broadcast %10 : vector<8x1xi32> to vector<8x2048xi32>
    %12 = vector.broadcast %1 : vector<1x2048xi32> to vector<8x2048xi32>
    %13 = arith.cmpi eq, %11, %12 : vector<8x2048xi32>
    %14 = arith.extui %13 : vector<8x2048xi1> to vector<8x2048xi32>
    %15 = arith.sitofp %14 : vector<8x2048xi32> to vector<8x2048xf32>
    %16 = arith.addf %9, %15 : vector<8x2048xf32>
    %17 = vector.extract_strided_slice %0 {offsets = [0, 2], sizes = [8, 1], strides = [1, 1]} : vector<8x8xi32> to vector<8x1xi32>
    %18 = vector.broadcast %17 : vector<8x1xi32> to vector<8x2048xi32>
    %19 = vector.broadcast %1 : vector<1x2048xi32> to vector<8x2048xi32>
    %20 = arith.cmpi eq, %18, %19 : vector<8x2048xi32>
    %21 = arith.extui %20 : vector<8x2048xi1> to vector<8x2048xi32>
    %22 = arith.sitofp %21 : vector<8x2048xi32> to vector<8x2048xf32>
    %23 = arith.addf %16, %22 : vector<8x2048xf32>
    %24 = vector.extract_strided_slice %0 {offsets = [0, 3], sizes = [8, 1], strides = [1, 1]} : vector<8x8xi32> to vector<8x1xi32>
    %25 = vector.broadcast %24 : vector<8x1xi32> to vector<8x2048xi32>
    %26 = vector.broadcast %1 : vector<1x2048xi32> to vector<8x2048xi32>
    %27 = arith.cmpi eq, %25, %26 : vector<8x2048xi32>
    %28 = arith.extui %27 : vector<8x2048xi1> to vector<8x2048xi32>
    %29 = arith.sitofp %28 : vector<8x2048xi32> to vector<8x2048xf32>
    %30 = arith.addf %23, %29 : vector<8x2048xf32>
    %31 = vector.extract_strided_slice %0 {offsets = [0, 4], sizes = [8, 1], strides = [1, 1]} : vector<8x8xi32> to vector<8x1xi32>
    %32 = vector.broadcast %31 : vector<8x1xi32> to vector<8x2048xi32>
    %33 = vector.broadcast %1 : vector<1x2048xi32> to vector<8x2048xi32>
    %34 = arith.cmpi eq, %32, %33 : vector<8x2048xi32>
    %35 = arith.extui %34 : vector<8x2048xi1> to vector<8x2048xi32>
    %36 = arith.sitofp %35 : vector<8x2048xi32> to vector<8x2048xf32>
    %37 = arith.addf %30, %36 : vector<8x2048xf32>
    %38 = vector.extract_strided_slice %0 {offsets = [0, 5], sizes = [8, 1], strides = [1, 1]} : vector<8x8xi32> to vector<8x1xi32>
    %39 = vector.broadcast %38 : vector<8x1xi32> to vector<8x2048xi32>
    %40 = vector.broadcast %1 : vector<1x2048xi32> to vector<8x2048xi32>
    %41 = arith.cmpi eq, %39, %40 : vector<8x2048xi32>
    %42 = arith.extui %41 : vector<8x2048xi1> to vector<8x2048xi32>
    %43 = arith.sitofp %42 : vector<8x2048xi32> to vector<8x2048xf32>
    %44 = arith.addf %37, %43 : vector<8x2048xf32>
    %45 = vector.extract_strided_slice %0 {offsets = [0, 6], sizes = [8, 1], strides = [1, 1]} : vector<8x8xi32> to vector<8x1xi32>
    %46 = vector.broadcast %45 : vector<8x1xi32> to vector<8x2048xi32>
    %47 = vector.broadcast %1 : vector<1x2048xi32> to vector<8x2048xi32>
    %48 = arith.cmpi eq, %46, %47 : vector<8x2048xi32>
    %49 = arith.extui %48 : vector<8x2048xi1> to vector<8x2048xi32>
    %50 = arith.sitofp %49 : vector<8x2048xi32> to vector<8x2048xf32>
    %51 = arith.addf %44, %50 : vector<8x2048xf32>
    %52 = vector.extract_strided_slice %0 {offsets = [0, 7], sizes = [8, 1], strides = [1, 1]} : vector<8x8xi32> to vector<8x1xi32>
    %53 = vector.broadcast %52 : vector<8x1xi32> to vector<8x2048xi32>
    %54 = vector.broadcast %1 : vector<1x2048xi32> to vector<8x2048xi32>
    %55 = arith.cmpi eq, %53, %54 : vector<8x2048xi32>
    %56 = arith.extui %55 : vector<8x2048xi1> to vector<8x2048xi32>
    %57 = arith.sitofp %56 : vector<8x2048xi32> to vector<8x2048xf32>
    %58 = arith.addf %51, %57 : vector<8x2048xf32>
    %c0_1 = arith.constant 0 : index
    %c0_2 = arith.constant 0 : index
    %59 = vector.load %arg2[%c0_1, %c0_2] : memref<2048x128xf32, #tpu.memory_space<vmem>>, vector<2048x128xf32>
    %cst_3 = arith.constant dense<0.000000e+00> : vector<8x128xf32>
    %60 = tpu.matmul %58, %59, %cst_3 {dimension_numbers = #tpu.dot_dimension_numbers<[1], [0], [0], [1], [0, 0, 1, 1], [], []>} : vector<8x2048xf32>, vector<2048x128xf32>, vector<8x128xf32> -> vector<8x128xf32>
    %cst_4 = arith.constant 0.00657894742 : f32
    %61 = vector.broadcast %cst_4 : f32 to vector<8x128xf32>
    %62 = arith.mulf %60, %61 : vector<8x128xf32>
    %cst_5 = arith.constant 0.000000e+00 : f32
    %63 = vector.broadcast %cst_5 : f32 to vector<8x128xf32>
    %64 = arith.subf %63, %62 : vector<8x128xf32>
    %65 = math.exp %64 : vector<8x128xf32>
    %cst_6 = arith.constant 1.000000e+00 : f32
    %66 = vector.broadcast %cst_6 : f32 to vector<8x128xf32>
    %67 = arith.addf %66, %65 : vector<8x128xf32>
    %68 = tpu.reciprocal %67 : vector<8x128xf32> -> vector<8x128xf32>
    %c0_7 = arith.constant 0 : index
    %c0_8 = arith.constant 0 : index
    %69 = vector.load %arg3[%c0_7, %c0_8] : memref<8x128xf32, #tpu.memory_space<vmem>>, vector<8x128xf32>
    tpu.vector_store %arg3[%c0_7, %c0_8], %68 {strides = array<i32>} : memref<8x128xf32, #tpu.memory_space<vmem>>, vector<8x128xf32>,
    return
  }
  func.func @transform_0(%arg0: i32) -> (i32, i32) {
    %c0_i32 = arith.constant 0 : i32
    %c0_i32_0 = arith.constant 0 : i32
    return %arg0, %c0_i32 : i32, i32
  }
  func.func @transform_1(%arg0: i32) -> (i32, i32) {
    %c0_i32 = arith.constant 0 : i32
    %c0_i32_0 = arith.constant 0 : i32
    %c0_i32_1 = arith.constant 0 : i32
    return %c0_i32, %c0_i32_0 : i32, i32
  }
  func.func @transform_2(%arg0: i32) -> (i32, i32) {
    %c0_i32 = arith.constant 0 : i32
    %c0_i32_0 = arith.constant 0 : i32
    return %arg0, %c0_i32 : i32, i32
  }
}

</mosaic_0001>

<bundles_post_ra>
// kernel: tpu_custom_call.1
= control target key start
LH: loop header
LB: loop body
LE: loop exit
PB: predicated region body
PF: predicated region fallthrough
CT: control target
= control target key end

     0   :  { %7 = vsyncpa [#allocation3], 0  ;;  %s3416_s0 = inlined_call_operand.hbm [shape: s32[8,8], index: 0, kind: input, shape index: {}]   ;;  %s3417_s1 = inlined_call_operand.hbm [shape: f32[2048,128], index: 1, kind: input, shape index: {}]   ;;  %s3418_s2 = inlined_call_operand.hbm [shape: f32[8,128], index: 2, kind: output, shape index: {}]  }
   0x1   :  { %8 = vsyncpa [#allocation6], 0 }
   0x2   :  { %9 = vsyncpa [#allocation4], 0  ;;  %s2194_s9 = smov [#allocation2]   ;;  %s2195_s11 = smov [#allocation5]  }
   0x3   :  { %s16_s10 = sshll.u32 %s2194_s9, 4  ;;  %s25_s12 = sshll.u32 %s2195_s11, 4  ;;  %s17_s10 = int_to_ptr.vmem [resolvable:$true] %s16_s10  ;;  %s2223_s12 = int_to_ptr.vmem [resolvable:$true] %s25_s12 }
   0x4   :  { %s2122_s15 = scalar_lea.hbm %s3416_s0, 128 }
   0x5   :  { %p2123_p0 = scmp.ne.s32.totalorder %s3416_s0, %s2122_s15  ;;  %p2126_p1 = scmp.lt.u32.totalorder %s2122_s15, %s3416_s0 }
   0x7   :  { %p2128_p2 = pnand %p2126_p1, %p2123_p0 }
   0x9   :  { %2131 = shalt.err (!%p2128_p2)
}
   0xa   :  { %s2132_s20 = scalar_lea.vmem %s17_s10, 128  ;;  %p2137_p4 = scmp.lt.s32.totalorder %s17_s10, %s17_s10 }
   0xb   :  { %p2133_p3 = scmp.ne.s32.totalorder %s17_s10, %s2132_s20  ;;  %p2138_p5 = scmp.lt.s32.totalorder %s2132_s20, %s2132_s20 }
   0xd   :  { %p2139_p6 = por %p2138_p5, %p2137_p4 }
   0xf   :  { %p2140_p7 = pnand %p2139_p6, %p2133_p3 }
  0x11   :  { %2143 = shalt.err (!%p2140_p7)
}
  0x12   :  { %19 = dma.hbm_to_vmem [thread:$0]  %s3416_s0, 128, %s17_s10, [#allocation3]  }
  0x13   :  { %s2144_s25 = scalar_lea.hbm %s3417_s1, 32768 }
  0x14   :  { %p2145_p8 = scmp.ne.s32.totalorder %s3417_s1, %s2144_s25  ;;  %p2148_p9 = scmp.lt.u32.totalorder %s2144_s25, %s3417_s1 }
  0x16   :  { %p2150_p10 = pnand %p2148_p9, %p2145_p8 }
  0x18   :  { %2153 = shalt.err (!%p2150_p10)
}
  0x19   :  { %s2154_s30 = scalar_lea.vmem %s2223_s12, 32768  ;;  %p2159_p12 = scmp.lt.s32.totalorder %s2223_s12, %s2223_s12 }
  0x1a   :  { %p2155_p11 = scmp.ne.s32.totalorder %s2223_s12, %s2154_s30  ;;  %p2160_p13 = scmp.lt.s32.totalorder %s2154_s30, %s2154_s30 }
  0x1c   :  { %p2161_p0 = por %p2160_p13, %p2159_p12 }
  0x1e   :  { %p2162_p1 = pnand %p2161_p0, %p2155_p11 }
  0x20   :  { %2165 = shalt.err (!%p2162_p1)
}
  0x21   :  { %s2196_s0 = smov 128   ;;  %s2197_s3 = smov 8  }
  0x22   :  { %31 = dma.hbm_to_vmem [thread:$0]  %s3417_s1, 32768, %s2223_s12, [#allocation6], %s2196_s0, %s2196_s0, %s2197_s3  }
  0x23   :  { %2188 = dma.done.wait [#allocation3], 128  }
  0x24   :  { %2189 = vsyncadd [#allocation3], 4294967168 }
  0x25   :  { %2190 = dma.done.wait [#allocation6], 32768  }
  0x26   :  { %2191 = vsyncadd [#allocation6], 4294934528  ;;  %v2198_v0 = vmov 2   ;;  %v2199_v1 = vmov 0   ;;  %v2254_v2 = vld [vmem:[#allocation2] sm:$0xff]  ;;  %v608_v3 = vld [vmem:[#allocation5 + $0x80] sm:$0xff] }
  0x27   :  { %2111 = vset.pattern.permute.xlu1 %v2198_v0  ;;  %2109 = vset.pattern.permute.xlu0 %v2199_v1  ;;  %v609_v4 = vld [vmem:[#allocation5 + $0x88] sm:$0xff]  ;;  %v640_v6 = vld [vmem:[#allocation5 + $0x180] sm:$0xff]  ;;  %v610_v15 = vld [vmem:[#allocation5 + $0x90] sm:$0xff]  ;;  %v2200_v22 = vmov 3   ;;  %v2201_v23 = vmov 1   ;;  %v2202_v38 = vmov 4  }
  0x28   :  { %191 = vperm.xlu1 %2111, %v2254_v2   ;;  %57 = vperm.xlu0 %2109, %v2254_v2   ;;  %v1839_v5 = vpack.c.bf16 %v609_v4, %v608_v3  ;;  %v641_v7 = vld [vmem:[#allocation5 + $0x188] sm:$0xff]  ;;  %v592_v8 = vld [vmem:[#allocation5] sm:$0xff]  ;;  %v611_v16 = vld [vmem:[#allocation5 + $0x98] sm:$0xff]  ;;  %v2203_v39 = vmov 5   ;;  %v2204_v54 = vmov 6   ;;  %v2205_v58 = vmov 7  }
  0x29   :  { %v1871_v9 = vpack.c.bf16 %v641_v7, %v640_v6  ;;  %v593_v10 = vld [vmem:[#allocation5 + $0x8] sm:$0xff]  ;;  %v624_v11 = vld [vmem:[#allocation5 + $0x100] sm:$0xff]  ;;  %v642_v17 = vld [vmem:[#allocation5 + $0x190] sm:$0xff]  ;;  %v1843_v18 = vpack.c.bf16 %v611_v16, %v610_v15  ;;  %s2207_s1 = smov [#allocation7]  }
  0x2a   :  { %v625_v12 = vld [vmem:[#allocation5 + $0x108] sm:$0xff]  ;;  %1840 = vmatprep.subr.bf16.mxu0 %v1839_v5  ;;  %v1841_v13 = vpack.c.bf16 %v593_v10, %v592_v8  ;;  %v643_v19 = vld [vmem:[#allocation5 + $0x198] sm:$0xff]  ;;  %v594_v20 = vld [vmem:[#allocation5 + $0x10] sm:$0xff]  ;;  %s1421_s6 = sshll.u32 %s2207_s1, 4  ;;  %s1422_s6 = int_to_ptr.vmem [resolvable:$true] %s1421_s6 }
  0x2b   :  { %v1873_v14 = vpack.c.bf16 %v625_v12, %v624_v11  ;;  %1872 = vmatprep.subr.bf16.mxu1 %v1871_v9  ;;  %v595_v21 = vld [vmem:[#allocation5 + $0x18] sm:$0xff]  ;;  %v1875_v24 = vpack.c.bf16 %v643_v19, %v642_v17  ;;  %v626_v25 = vld [vmem:[#allocation5 + $0x110] sm:$0xff]  ;;  %v612_v27 = vld [vmem:[#allocation5 + $0xa0] sm:$0xff]  ;;  %s2166_s7 = scalar_lea.vmem %s1422_s6, 128  ;;  %p2171_p3 = scmp.lt.s32.totalorder %s1422_s6, %s1422_s6 }
  0x2c   :  { %2112 = vset.pattern.permute.xlu1 %v2200_v22  ;;  %2110 = vset.pattern.permute.xlu0 %v2201_v23  ;;  %v627_v26 = vld [vmem:[#allocation5 + $0x118] sm:$0xff]  ;;  %v613_v28 = vld [vmem:[#allocation5 + $0xa8] sm:$0xff]  ;;  %v644_v29 = vld [vmem:[#allocation5 + $0x1a0] sm:$0xff]  ;;  %v1845_v31 = vpack.c.bf16 %v595_v21, %v594_v20  ;;  %p2167_p2 = scmp.ne.s32.totalorder %s1422_s6, %s2166_s7  ;;  %p2172_p4 = scmp.lt.s32.totalorder %s2166_s7, %s2166_s7 }
  0x2d   :  { %258 = vperm.xlu1 %2112, %v2254_v2   ;;  %124 = vperm.xlu0 %2110, %v2254_v2   ;;  %v645_v30 = vld [vmem:[#allocation5 + $0x1a8] sm:$0xff]  ;;  %v1877_v32 = vpack.c.bf16 %v627_v26, %v626_v25  ;;  %v1847_v33 = vpack.c.bf16 %v613_v28, %v612_v27  ;;  %v596_v35 = vld [vmem:[#allocation5 + $0x20] sm:$0xff]  ;;  %v614_v41 = vld [vmem:[#allocation5 + $0xb0] sm:$0xff] }
  0x2e   :  { %1842 = vmatpush3.bf16.msra.mxu0 %v1841_v13  ;;  %1874 = vmatpush3.bf16.msra.mxu1 %v1873_v14  ;;  %v1879_v34 = vpack.c.bf16 %v645_v30, %v644_v29  ;;  %v597_v36 = vld [vmem:[#allocation5 + $0x28] sm:$0xff]  ;;  %v628_v37 = vld [vmem:[#allocation5 + $0x120] sm:$0xff]  ;;  %v615_v42 = vld [vmem:[#allocation5 + $0xb8] sm:$0xff]  ;;  %p2173_p5 = por %p2172_p4, %p2171_p3 }
  0x2f   :  { %1844 = vmatprep.subr.bf16.mxu0 %v1843_v18  ;;  %1876 = vmatprep.subr.bf16.mxu1 %v1875_v24  ;;  %v629_v40 = vld [vmem:[#allocation5 + $0x128] sm:$0xff]  ;;  %v646_v43 = vld [vmem:[#allocation5 + $0x1b0] sm:$0xff]  ;;  %v647_v44 = vld [vmem:[#allocation5 + $0x1b8] sm:$0xff]  ;;  %v1849_v45 = vpack.c.bf16 %v597_v36, %v596_v35  ;;  %v1851_v47 = vpack.c.bf16 %v615_v42, %v614_v41 }
  0x30   :  { %v1881_v46 = vpack.c.bf16 %v629_v40, %v628_v37  ;;  %v598_v48 = vld [vmem:[#allocation5 + $0x30] sm:$0xff]  ;;  %v599_v49 = vld [vmem:[#allocation5 + $0x38] sm:$0xff]  ;;  %v1883_v50 = vpack.c.bf16 %v647_v44, %v646_v43  ;;  %v616_v53 = vld [vmem:[#allocation5 + $0xc0] sm:$0xff]  ;;  %p2174_p6 = pnand %p2173_p5, %p2167_p2 }
  0x31   :  { %2113 = vset.pattern.permute.xlu1 %v2202_v38  ;;  %2114 = vset.pattern.permute.xlu0 %v2203_v39  ;;  %v630_v51 = vld [vmem:[#allocation5 + $0x130] sm:$0xff]  ;;  %v631_v52 = vld [vmem:[#allocation5 + $0x138] sm:$0xff]  ;;  %v617_v55 = vld [vmem:[#allocation5 + $0xc8] sm:$0xff]  ;;  %v1853_v59 = vpack.c.bf16 %v599_v49, %v598_v48 }
  0x32   :  { %325 = vperm.xlu1 %2113, %v2254_v2   ;;  %392 = vperm.xlu0 %2114, %v2254_v2   ;;  %v648_v56 = vld [vmem:[#allocation5 + $0x1c0] sm:$0xff]  ;;  %v649_v57 = vld [vmem:[#allocation5 + $0x1c8] sm:$0xff]  ;;  %v1885_v60 = vpack.c.bf16 %v631_v52, %v630_v51  ;;  %v1855_v0 = vpack.c.bf16 %v617_v55, %v616_v53  ;;  %v618_v4 = vld [vmem:[#allocation5 + $0xd0] sm:$0xff] }
  0x33   :  { %1846 = vmatpush3.bf16.msra.mxu0 %v1845_v31  ;;  %1878 = vmatpush3.bf16.msra.mxu1 %v1877_v32  ;;  %v600_v61 = vld [vmem:[#allocation5 + $0x40] sm:$0xff]  ;;  %v601_v62 = vld [vmem:[#allocation5 + $0x48] sm:$0xff]  ;;  %v1887_v1 = vpack.c.bf16 %v649_v57, %v648_v56  ;;  %v619_v5 = vld [vmem:[#allocation5 + $0xd8] sm:$0xff] }
  0x34   :  { %1848 = vmatprep.subr.bf16.mxu0 %v1847_v33  ;;  %1880 = vmatprep.subr.bf16.mxu1 %v1879_v34  ;;  %v632_v63 = vld [vmem:[#allocation5 + $0x140] sm:$0xff]  ;;  %v633_v3 = vld [vmem:[#allocation5 + $0x148] sm:$0xff]  ;;  %v650_v6 = vld [vmem:[#allocation5 + $0x1d0] sm:$0xff]  ;;  %v1857_v8 = vpack.c.bf16 %v601_v62, %v600_v61  ;;  %v1859_v10 = vpack.c.bf16 %v619_v5, %v618_v4 }
  0x35   :  { %v651_v7 = vld [vmem:[#allocation5 + $0x1d8] sm:$0xff]  ;;  %v1889_v9 = vpack.c.bf16 %v633_v3, %v632_v63  ;;  %v602_v11 = vld [vmem:[#allocation5 + $0x50] sm:$0xff]  ;;  %v620_v16 = vld [vmem:[#allocation5 + $0xe0] sm:$0xff] }
  0x36   :  { %2115 = vset.pattern.permute.xlu1 %v2204_v54  ;;  %2117 = vset.pattern.permute.xlu0 %v2205_v58  ;;  %v603_v12 = vld [vmem:[#allocation5 + $0x58] sm:$0xff]  ;;  %v634_v13 = vld [vmem:[#allocation5 + $0x150] sm:$0xff]  ;;  %v1891_v14 = vpack.c.bf16 %v651_v7, %v650_v6  ;;  %v621_v17 = vld [vmem:[#allocation5 + $0xe8] sm:$0xff] }
  0x37   :  { %459 = vperm.xlu1 %2115, %v2254_v2   ;;  %1850 = vmatpush3.bf16.msra.mxu0 %v1849_v45  ;;  %v635_v15 = vld [vmem:[#allocation5 + $0x158] sm:$0xff]  ;;  %v652_v18 = vld [vmem:[#allocation5 + $0x1e0] sm:$0xff]  ;;  %v653_v19 = vld [vmem:[#allocation5 + $0x1e8] sm:$0xff]  ;;  %v1861_v20 = vpack.c.bf16 %v603_v12, %v602_v11 }
  0x38   :  { %1882 = vmatpush3.bf16.msra.mxu1 %v1881_v46  ;;  %1852 = vmatprep.subr.bf16.mxu0 %v1851_v47  ;;  %v1893_v21 = vpack.c.bf16 %v635_v15, %v634_v13  ;;  %v604_v22 = vld [vmem:[#allocation5 + $0x60] sm:$0xff]  ;;  %v605_v23 = vld [vmem:[#allocation5 + $0x68] sm:$0xff]  ;;  %v1895_v25 = vpack.c.bf16 %v653_v19, %v652_v18  ;;  %v622_v27 = vld [vmem:[#allocation5 + $0xf0] sm:$0xff]  ;;  %v39_v47 = vlaneseq }
  0x39   :  { %1884 = vmatprep.subr.bf16.mxu1 %v1883_v50  ;;  %v636_v24 = vld [vmem:[#allocation5 + $0x160] sm:$0xff]  ;;  %v637_v26 = vld [vmem:[#allocation5 + $0x168] sm:$0xff]  ;;  %v623_v28 = vld [vmem:[#allocation5 + $0xf8] sm:$0xff]  ;;  %v1865_v31 = vpack.c.bf16 %v605_v23, %v604_v22 }
  0x3a   :  { %v654_v29 = vld [vmem:[#allocation5 + $0x1f0] sm:$0xff]  ;;  %v655_v30 = vld [vmem:[#allocation5 + $0x1f8] sm:$0xff]  ;;  %v1897_v32 = vpack.c.bf16 %v637_v26, %v636_v24  ;;  %v1867_v33 = vpack.c.bf16 %v623_v28, %v622_v27  ;;  %v672_v39 = vld [vmem:[#allocation5 + $0x280] sm:$0xff]  ;;  %v2264_v48 = vand.u32 127, %v39_v47 }
  0x3b   :  { %2116 = vset.pattern.permute.xlu1 %v2205_v58  ;;  %1854 = vmatpush3.bf16.msra.mxu0 %v1853_v59  ;;  %v606_v34 = vld [vmem:[#allocation5 + $0x70] sm:$0xff]  ;;  %v607_v35 = vld [vmem:[#allocation5 + $0x78] sm:$0xff]  ;;  %v1899_v37 = vpack.c.bf16 %v655_v30, %v654_v29  ;;  %v673_v40 = vld [vmem:[#allocation5 + $0x288] sm:$0xff] }
  0x3c   :  { %526 = vperm.xlu1 %2116, %v2254_v2   ;;  %1886 = vmatpush3.bf16.msra.mxu1 %v1885_v60  ;;  %v1863_v2 = vpack.c.bf16 %v621_v17, %v620_v16  ;;  %v638_v36 = vld [vmem:[#allocation5 + $0x170] sm:$0xff]  ;;  %v639_v38 = vld [vmem:[#allocation5 + $0x178] sm:$0xff]  ;;  %v704_v41 = vld [vmem:[#allocation5 + $0x380] sm:$0xff]  ;;  %v1869_v43 = vpack.c.bf16 %v607_v35, %v606_v34  ;;  %v1903_v45 = vpack.c.bf16 %v673_v40, %v672_v39  ;;  %v2287_v59 = vadd.s32 128, %v2264_v48 }
  0x3d   :  { %1856 = vmatprep.subr.bf16.mxu0 %v1855_v0  ;;  %1888 = vmatprep.subr.bf16.mxu1 %v1887_v1  ;;  %v705_v42 = vld [vmem:[#allocation5 + $0x388] sm:$0xff]  ;;  %v1901_v44 = vpack.c.bf16 %v639_v38, %v638_v36  ;;  %v2266_v49 = vld [vmem:[#allocation5 + $0x200] sm:$0xff]  ;;  %v2274_v53 = vld [vmem:[#allocation5 + $0x290] sm:$0xff]  ;;  %v2306_v5 = vadd.s32 384, %v2264_v48  ;;  %v2309_v6 = vadd.s32 256, %v2264_v48  ;;  %v2328_v15 = vadd.s32 640, %v2264_v48 }
  0x3e   :  { %v1935_v46 = vpack.c.bf16 %v705_v42, %v704_v41  ;;  %v2268_v50 = vld [vmem:[#allocation5 + $0x208] sm:$0xff]  ;;  %v2270_v51 = vld [vmem:[#allocation5 + $0x300] sm:$0xff]  ;;  %v2276_v54 = vld [vmem:[#allocation5 + $0x298] sm:$0xff]  ;;  %v2331_v16 = vadd.s32 896, %v2264_v48  ;;  %v2350_v24 = vadd.s32 512, %v2264_v48  ;;  %v2373_v35 = vadd.s32 768, %v2264_v48 }
  0x3f   :  { %1858 = vmatpush3.bf16.msra.mxu0 %v1857_v8  ;;  %v2272_v52 = vld [vmem:[#allocation5 + $0x308] sm:$0xff]  ;;  %v2278_v55 = vld [vmem:[#allocation5 + $0x390] sm:$0xff]  ;;  %v2280_v56 = vld [vmem:[#allocation5 + $0x398] sm:$0xff]  ;;  %v2376_v36 = vadd.s32 1152, %v2264_v48  ;;  %v2401_v38 = vadd.s32 1408, %v2264_v48 }
  0x40   :  { %1890 = vmatpush3.bf16.msra.mxu1 %v1889_v9  ;;  %1860 = vmatprep.subr.bf16.mxu0 %v1859_v10  ;;  %3458 = vst [vmem:[#allocation11_spill] sm:$0xff] %v2278_v55  ;;  %v2282_v57 = vld [vmem:[#allocation5 + $0x210] sm:$0xff]  ;;  %v2284_v58 = vld [vmem:[#allocation5 + $0x218] sm:$0xff]  ;;  %v2293_v62 = vld [vmem:[#allocation5 + $0x2a0] sm:$0xff] }
  0x41   :  { %1892 = vmatprep.subr.bf16.mxu1 %v1891_v14  ;;  %v2289_v60 = vld [vmem:[#allocation5 + $0x310] sm:$0xff]  ;;  %v2291_v61 = vld [vmem:[#allocation5 + $0x318] sm:$0xff]  ;;  %v2295_v63 = vld [vmem:[#allocation5 + $0x2a8] sm:$0xff]  ;;  %3468 = vst [vmem:[#allocation21_spill] sm:$0xff] %v2350_v24 }
  0x42   :  { %v2297_v0 = vld [vmem:[#allocation5 + $0x3a0] sm:$0xff]  ;;  %v2299_v1 = vld [vmem:[#allocation5 + $0x3a8] sm:$0xff]  ;;  %v2315_v9 = vld [vmem:[#allocation5 + $0x2b0] sm:$0xff]  ;;  %3473 = vst [vmem:[#allocation26_spill] sm:$0xff] %v2373_v35 }
  0x43   :  { %1862 = vmatpush3.bf16.msra.mxu0 %v1861_v20  ;;  %3459 = vst [vmem:[#allocation12_spill] sm:$0xff] %v2297_v0  ;;  %3460 = vst [vmem:[#allocation13_spill] sm:$0xff] %v2299_v1  ;;  %v2301_v3 = vld [vmem:[#allocation5 + $0x220] sm:$0xff]  ;;  %v2303_v4 = vld [vmem:[#allocation5 + $0x228] sm:$0xff] }
  0x44   :  { %1894 = vmatpush3.bf16.msra.mxu1 %v1893_v21  ;;  %1864 = vmatprep.subr.bf16.mxu0 %v1863_v2  ;;  %3461 = vst [vmem:[#allocation14_spill] sm:$0xff] %v2301_v3  ;;  %v2311_v7 = vld [vmem:[#allocation5 + $0x320] sm:$0xff]  ;;  %v2313_v8 = vld [vmem:[#allocation5 + $0x328] sm:$0xff]  ;;  %v2317_v10 = vld [vmem:[#allocation5 + $0x2b8] sm:$0xff] }
  0x45   :  { %1896 = vmatprep.subr.bf16.mxu1 %v1895_v25  ;;  %v2319_v11 = vld [vmem:[#allocation5 + $0x3b0] sm:$0xff]  ;;  %v2321_v12 = vld [vmem:[#allocation5 + $0x3b8] sm:$0xff]  ;;  %v2337_v19 = vld [vmem:[#allocation5 + $0x2c0] sm:$0xff]  ;;  %3474 = vst [vmem:[#allocation27_spill] sm:$0xff] %v2376_v36 }
  0x46   :  { %3462 = vst [vmem:[#allocation15_spill] sm:$0xff] %v2319_v11  ;;  %3463 = vst [vmem:[#allocation16_spill] sm:$0xff] %v2321_v12  ;;  %v2323_v13 = vld [vmem:[#allocation5 + $0x230] sm:$0xff]  ;;  %v2325_v14 = vld [vmem:[#allocation5 + $0x238] sm:$0xff] }
  0x47   :  { %1866 = vmatpush3.bf16.msra.mxu0 %v1865_v31  ;;  %3464 = vst [vmem:[#allocation17_spill] sm:$0xff] %v2323_v13  ;;  %v2333_v17 = vld [vmem:[#allocation5 + $0x330] sm:$0xff]  ;;  %v2335_v18 = vld [vmem:[#allocation5 + $0x338] sm:$0xff]  ;;  %v2339_v20 = vld [vmem:[#allocation5 + $0x2c8] sm:$0xff] }
  0x48   :  { %1898 = vmatpush3.bf16.msra.mxu1 %v1897_v32  ;;  %1868 = vmatprep.subr.bf16.mxu0 %v1867_v33  ;;  %v2341_v21 = vld [vmem:[#allocation5 + $0x3c0] sm:$0xff]  ;;  %v2343_v2 = vld [vmem:[#allocation5 + $0x3c8] sm:$0xff]  ;;  %v2360_v29 = vld [vmem:[#allocation5 + $0x2d0] sm:$0xff]  ;;  %3480 = vst [vmem:[#allocation33_spill] sm:$0xff] %v2401_v38 }
  0x49   :  { %1900 = vmatprep.subr.bf16.mxu1 %v1899_v37  ;;  %3465 = vst [vmem:[#allocation18_spill] sm:$0xff] %v2341_v21  ;;  %3466 = vst [vmem:[#allocation19_spill] sm:$0xff] %v2343_v2  ;;  %v2345_v22 = vld [vmem:[#allocation5 + $0x240] sm:$0xff]  ;;  %v2347_v23 = vld [vmem:[#allocation5 + $0x248] sm:$0xff] }
  0x4a   :  { %3467 = vst [vmem:[#allocation20_spill] sm:$0xff] %v2345_v22  ;;  %v2356_v27 = vld [vmem:[#allocation5 + $0x340] sm:$0xff]  ;;  %v2358_v28 = vld [vmem:[#allocation5 + $0x348] sm:$0xff]  ;;  %v2362_v30 = vld [vmem:[#allocation5 + $0x2d8] sm:$0xff]  ;;  %v2206_v22 = vmov 0.0  }
  0x4b   :  { %1870 = vmatpush3.bf16.msra.mxu0 %v1869_v43  ;;  %v2364_v31 = vld [vmem:[#allocation5 + $0x3d0] sm:$0xff]  ;;  %v2366_v32 = vld [vmem:[#allocation5 + $0x3d8] sm:$0xff]  ;;  %v2388_v42 = vld [vmem:[#allocation5 + $0x2e0] sm:$0xff] }
  0x4c   :  { %1902 = vmatpush3.bf16.msra.mxu1 %v1901_v44  ;;  %1904 = vmatprep.subr.bf16.mxu0 %v1903_v45  ;;  %3469 = vst [vmem:[#allocation22_spill] sm:$0xff] %v2364_v31  ;;  %3470 = vst [vmem:[#allocation23_spill] sm:$0xff] %v2366_v32  ;;  %v2368_v33 = vld [vmem:[#allocation5 + $0x250] sm:$0xff]  ;;  %v2370_v34 = vld [vmem:[#allocation5 + $0x258] sm:$0xff] }
  0x4d   :  { %1936 = vmatprep.subr.bf16.mxu1 %v1935_v46  ;;  %3471 = vst [vmem:[#allocation24_spill] sm:$0xff] %v2368_v33  ;;  %3472 = vst [vmem:[#allocation25_spill] sm:$0xff] %v2370_v34  ;;  %v2384_v40 = vld [vmem:[#allocation5 + $0x350] sm:$0xff]  ;;  %v2386_v41 = vld [vmem:[#allocation5 + $0x358] sm:$0xff] }
  0x4e   :  { %3475 = vst [vmem:[#allocation28_spill] sm:$0xff] %v2384_v40  ;;  %v2390_v43 = vld [vmem:[#allocation5 + $0x2e8] sm:$0xff]  ;;  %v2392_v44 = vld [vmem:[#allocation5 + $0x3e0] sm:$0xff]  ;;  %v2415_v24 = vld [vmem:[#allocation5 + $0x2f0] sm:$0xff] }
  0x4f   :  { %3476 = vst [vmem:[#allocation29_spill] sm:$0xff] %v2392_v44  ;;  %v2394_v45 = vld [vmem:[#allocation5 + $0x3e8] sm:$0xff]  ;;  %v2396_v46 = vld [vmem:[#allocation5 + $0x260] sm:$0xff]  ;;  %3483 = vst [vmem:[#allocation36_spill] sm:$0xff] %v2415_v24 }
  0x50   :  { %3477 = vst [vmem:[#allocation30_spill] sm:$0xff] %v2394_v45  ;;  %3478 = vst [vmem:[#allocation31_spill] sm:$0xff] %v2396_v46  ;;  %v2398_v47 = vld [vmem:[#allocation5 + $0x268] sm:$0xff]  ;;  %v2411_v36 = vld [vmem:[#allocation5 + $0x360] sm:$0xff] }
  0x51   :  { %3479 = vst [vmem:[#allocation32_spill] sm:$0xff] %v2398_v47  ;;  %3481 = vst [vmem:[#allocation34_spill] sm:$0xff] %v2411_v36  ;;  %v2413_v35 = vld [vmem:[#allocation5 + $0x368] sm:$0xff]  ;;  %v2417_v55 = vld [vmem:[#allocation5 + $0x2f8] sm:$0xff] }
  0x52   :  { %3482 = vst [vmem:[#allocation35_spill] sm:$0xff] %v2413_v35  ;;  %3484 = vst [vmem:[#allocation37_spill] sm:$0xff] %v2417_v55  ;;  %v2427_v38 = vld [vmem:[#allocation5 + $0x3f0] sm:$0xff]  ;;  %v2429_v0 = vld [vmem:[#allocation5 + $0x3f8] sm:$0xff] }
  0x53   :  { %3485 = vst [vmem:[#allocation38_spill] sm:$0xff] %v2427_v38  ;;  %3486 = vst [vmem:[#allocation39_spill] sm:$0xff] %v2429_v0  ;;  %v2431_v1 = vld [vmem:[#allocation5 + $0x270] sm:$0xff]  ;;  %v2441_v11 = vld [vmem:[#allocation5 + $0x278] sm:$0xff] }
  0x54   :  { %3487 = vst [vmem:[#allocation40_spill] sm:$0xff] %v2431_v1  ;;  %3488 = vst [vmem:[#allocation41_spill] sm:$0xff] %v2441_v11  ;;  %v2443_v25 = vld [vmem:[#allocation5 + $0x370] sm:$0xff]  ;;  %v2445_v12 = vld [vmem:[#allocation5 + $0x378] sm:$0xff] }
  0x55   :  { %3489 = vst [vmem:[#allocation42_spill] sm:$0xff] %v2443_v25  ;;  %3490 = vst [vmem:[#allocation43_spill] sm:$0xff] %v2445_v12  ;;  %v2455_v21 = vld [vmem:[#allocation5 + $0x480] sm:$0xff]  ;;  %v2457_v37 = vld [vmem:[#allocation5 + $0x488] sm:$0xff] }
  0x56   :  { %3491 = vst [vmem:[#allocation44_spill] sm:$0xff] %v2455_v21  ;;  %3492 = vst [vmem:[#allocation45_spill] sm:$0xff] %v2457_v37  ;;  %v2459_v2 = vld [vmem:[#allocation5 + $0x580] sm:$0xff]  ;;  %v2469_v31 = vld [vmem:[#allocation5 + $0x588] sm:$0xff] }
  0x57   :  { %3493 = vst [vmem:[#allocation46_spill] sm:$0xff] %v2459_v2  ;;  %3494 = vst [vmem:[#allocation47_spill] sm:$0xff] %v2469_v31  ;;  %v2471_v26 = vld [vmem:[#allocation5 + $0x400] sm:$0xff]  ;;  %v2473_v32 = vld [vmem:[#allocation5 + $0x408] sm:$0xff] }
  0x58   :  { %3495 = vst [vmem:[#allocation48_spill] sm:$0xff] %v2471_v26  ;;  %3496 = vst [vmem:[#allocation49_spill] sm:$0xff] %v2473_v32 }
  0xa7   :  { %v2475_v33 = vpop.permute.xlu1 %191  ;;  %v2477_v34 = vpop.permute.xlu0 %57 }
  0xa8   :  { %vm60_vm0 = vcmp.eq.s32.totalorder %v2477_v34, %v2287_v59  ;;  %vm194_vm1 = vcmp.eq.s32.totalorder %v2475_v33, %v2287_v59  ;;  %vm62_vm2 = vcmp.eq.s32.totalorder %v2477_v34, %v2306_v5  ;;  %vm196_vm3 = vcmp.eq.s32.totalorder %v2475_v33, %v2306_v5 }
  0xa9   :  { %vm59_vm4 = vcmp.eq.s32.totalorder %v2477_v34, %v2264_v48  ;;  %vm193_vm5 = vcmp.eq.s32.totalorder %v2475_v33, %v2264_v48  ;;  %vm61_vm6 = vcmp.eq.s32.totalorder %v2477_v34, %v2309_v6  ;;  %vm195_vm7 = vcmp.eq.s32.totalorder %v2475_v33, %v2309_v6 }
  0xaa   :  { %v1432_v3 = vsel %vm60_vm0, 1.0, %v2206_v22  ;;  %v1464_v39 = vsel %vm194_vm1, 1.0, %v2206_v22  ;;  %v1434_v2 = vsel %vm62_vm2, 1.0, %v2206_v22  ;;  %v1466_v13 = vsel %vm196_vm3, 1.0, %v2206_v22 }
  0xab   :  { %v1431_v32 = vsel %vm59_vm4, 1.0, %v2206_v22  ;;  %v1463_v25 = vsel %vm193_vm5, 1.0, %v2206_v22  ;;  %v1433_v12 = vsel %vm61_vm6, 1.0, %v2206_v22  ;;  %v1465_v21 = vsel %vm195_vm7, 1.0, %v2206_v22 }
  0xac   :  { %v2515_v31 = vpop.permute.xlu1 %258  ;;  %v2517_v26 = vpop.permute.xlu0 %124  ;;  %vm64_vm6 = vcmp.eq.s32.totalorder %v2477_v34, %v2328_v15 }
  0xad   :  { %vm127_vm8 = vcmp.eq.s32.totalorder %v2517_v26, %v2287_v59  ;;  %vm261_vm9 = vcmp.eq.s32.totalorder %v2515_v31, %v2287_v59  ;;  %vm129_vm10 = vcmp.eq.s32.totalorder %v2517_v26, %v2306_v5  ;;  %vm263_vm11 = vcmp.eq.s32.totalorder %v2515_v31, %v2306_v5 }
  0xae   :  { %v1448_v37 = vsel %vm127_vm8, 1.0, %v2206_v22  ;;  %v1480_v38 = vsel %vm261_vm9, 1.0, %v2206_v22  ;;  %v1450_v0 = vsel %vm129_vm10, 1.0, %v2206_v22  ;;  %v1482_v1 = vsel %vm263_vm11, 1.0, %v2206_v22 }
  0xaf   :  { %v175_v11 = vadd.f32 %v1448_v37, %v1432_v3  ;;  %v177_v36 = vadd.f32 %v1450_v0, %v1434_v2  ;;  %vm126_vm12 = vcmp.eq.s32.totalorder %v2517_v26, %v2264_v48  ;;  %vm260_vm13 = vcmp.eq.s32.totalorder %v2515_v31, %v2264_v48 }
  0xb0   :  { %v1447_v35 = vsel %vm126_vm12, 1.0, %v2206_v22  ;;  %v1479_v24 = vsel %vm260_vm13, 1.0, %v2206_v22  ;;  %vm128_vm14 = vcmp.eq.s32.totalorder %v2517_v26, %v2309_v6  ;;  %vm262_vm15 = vcmp.eq.s32.totalorder %v2515_v31, %v2309_v6 }
  0xb1   :  { %v2545_v55 = vpop.permute.xlu1 %325  ;;  %v2547_v3 = vpop.permute.xlu0 %392  ;;  %v242_v0 = vadd.f32 %v1464_v39, %v175_v11  ;;  %v244_v2 = vadd.f32 %v1466_v13, %v177_v36  ;;  %v174_v37 = vadd.f32 %v1447_v35, %v1431_v32  ;;  %v1449_v44 = vsel %vm128_vm14, 1.0, %v2206_v22 }
  0xb2   :  { %vm328_vm0 = vcmp.eq.s32.totalorder %v2545_v55, %v2287_v59  ;;  %vm395_vm1 = vcmp.eq.s32.totalorder %v2547_v3, %v2287_v59  ;;  %vm330_vm2 = vcmp.eq.s32.totalorder %v2545_v55, %v2306_v5  ;;  %vm397_vm3 = vcmp.eq.s32.totalorder %v2547_v3, %v2306_v5 }
  0xb3   :  { %v309_v45 = vadd.f32 %v1480_v38, %v242_v0  ;;  %v1496_v46 = vsel %vm328_vm0, 1.0, %v2206_v22  ;;  %v1512_v11 = vsel %vm395_vm1, 1.0, %v2206_v22  ;;  %v311_v13 = vadd.f32 %v1482_v1, %v244_v2 }
  0xb4   :  { %v1498_v32 = vsel %vm330_vm2, 1.0, %v2206_v22  ;;  %v1514_v35 = vsel %vm397_vm3, 1.0, %v2206_v22  ;;  %v241_v36 = vadd.f32 %v1463_v25, %v174_v37  ;;  %vm327_vm4 = vcmp.eq.s32.totalorder %v2545_v55, %v2264_v48 }
  0xb5   :  { %v376_v39 = vadd.f32 %v1496_v46, %v309_v45  ;;  %v378_v47 = vadd.f32 %v1498_v32, %v311_v13  ;;  %v1495_v40 = vsel %vm327_vm4, 1.0, %v2206_v22  ;;  %vm394_vm5 = vcmp.eq.s32.totalorder %v2547_v3, %v2264_v48 }
  0xb6   :  { %v2569_v38 = vpop.permute.xlu1 %459  ;;  %v308_v1 = vadd.f32 %v1479_v24, %v241_v36  ;;  %v1511_v0 = vsel %vm394_vm5, 1.0, %v2206_v22  ;;  %v176_v2 = vadd.f32 %v1449_v44, %v1433_v12  ;;  %v1481_v25 = vsel %vm262_vm15, 1.0, %v2206_v22 }
  0xb7   :  { %v443_v45 = vadd.f32 %v1512_v11, %v376_v39  ;;  %vm462_vm7 = vcmp.eq.s32.totalorder %v2569_v38, %v2287_v59  ;;  %v445_v46 = vadd.f32 %v1514_v35, %v378_v47  ;;  %vm464_vm8 = vcmp.eq.s32.totalorder %v2569_v38, %v2306_v5 }
  0xb8   :  { %v1528_v37 = vsel %vm462_vm7, 1.0, %v2206_v22  ;;  %v1530_v24 = vsel %vm464_vm8, 1.0, %v2206_v22  ;;  %v375_v13 = vadd.f32 %v1495_v40, %v308_v1  ;;  %vm461_vm9 = vcmp.eq.s32.totalorder %v2569_v38, %v2264_v48 }
  0xb9   :  { %v510_v12 = vadd.f32 %v1528_v37, %v443_v45  ;;  %v512_v44 = vadd.f32 %v1530_v24, %v445_v46  ;;  %v1527_v32 = vsel %vm461_vm9, 1.0, %v2206_v22  ;;  %v243_v11 = vadd.f32 %v1465_v21, %v176_v2  ;;  %v2604_v2 = vld [vmem:[#allocation5 + $0x508] sm:$0xff] }
  0xba   :  { %v442_v36 = vadd.f32 %v1511_v0, %v375_v13  ;;  %vm329_vm10 = vcmp.eq.s32.totalorder %v2545_v55, %v2309_v6  ;;  %vm396_vm11 = vcmp.eq.s32.totalorder %v2547_v3, %v2309_v6  ;;  %vm463_vm12 = vcmp.eq.s32.totalorder %v2569_v38, %v2309_v6  ;;  %v2602_v0 = vld [vmem:[#allocation5 + $0x500] sm:$0xff] }
  0xbb   :  { %v2591_v47 = vpop.permute.xlu1 %526  ;;  %v310_v40 = vadd.f32 %v1481_v25, %v243_v11  ;;  %v1497_v35 = vsel %vm329_vm10, 1.0, %v2206_v22  ;;  %v1513_v39 = vsel %vm396_vm11, 1.0, %v2206_v22  ;;  %v1529_v1 = vsel %vm463_vm12, 1.0, %v2206_v22 }
  0xbc   :  { %vm529_vm13 = vcmp.eq.s32.totalorder %v2591_v47, %v2287_v59  ;;  %vm531_vm14 = vcmp.eq.s32.totalorder %v2591_v47, %v2306_v5  ;;  %v509_v21 = vadd.f32 %v1527_v32, %v442_v36  ;;  %vm528_vm15 = vcmp.eq.s32.totalorder %v2591_v47, %v2264_v48  ;;  %v2611_v5 = vld [vmem:[#allocation5 + $0x490] sm:$0xff]  ;;  %v2613_v32 = vld [vmem:[#allocation5 + $0x498] sm:$0xff] }
  0xbd   :  { %v1544_v25 = vsel %vm529_vm13, 1.0, %v2206_v22  ;;  %v1546_v45 = vsel %vm531_vm14, 1.0, %v2206_v22  ;;  %v1543_v46 = vsel %vm528_vm15, 1.0, %v2206_v22  ;;  %v377_v37 = vadd.f32 %v1497_v35, %v310_v40 }
  0xbe   :  { %v577_v24 = vadd.f32 %v1544_v25, %v510_v12  ;;  %v579_v59 = vadd.f32 %v1546_v45, %v512_v44  ;;  %v576_v13 = vadd.f32 %v1543_v46, %v509_v21  ;;  %vm530_vm0 = vcmp.eq.s32.totalorder %v2591_v47, %v2309_v6 }
  0xbf   :  { %v444_v11 = vadd.f32 %v1513_v39, %v377_v37  ;;  %vm131_vm1 = vcmp.eq.s32.totalorder %v2517_v26, %v2328_v15  ;;  %vm198_vm2 = vcmp.eq.s32.totalorder %v2475_v33, %v2328_v15  ;;  %v2001_v36 = vpack.c.bf16 %v2604_v2, %v2602_v0 }
  0xc0   :  { %912 = vmatprep.mubr.f32.mxu0 %v577_v24  ;;  %982 = vmatprep.mubr.f32.mxu1 %v579_v59  ;;  %v1545_v12 = vsel %vm530_vm0, 1.0, %v2206_v22  ;;  %v1436_v6 = vsel %vm64_vm6, 1.0, %v2206_v22  ;;  %v1452_v44 = vsel %vm131_vm1, 1.0, %v2206_v22  ;;  %vm265_vm3 = vcmp.eq.s32.totalorder %v2515_v31, %v2328_v15 }
  0xc1   :  { %913 = vmatmul.mubr.f32.vlgmr.msra.gmra.mrb[0].mxu0 %v576_v13  ;;  %v511_v40 = vadd.f32 %v1529_v1, %v444_v11  ;;  %v179_v35 = vadd.f32 %v1452_v44, %v1436_v6  ;;  %vm332_vm4 = vcmp.eq.s32.totalorder %v2545_v55, %v2328_v15  ;;  %v1971_v39 = vpack.c.bf16 %v2613_v32, %v2611_v5  ;;  %v3008_v5 = vld [vmem:[#allocation5 + $0x4d0] sm:$0xff]  ;;  %v3010_v32 = vld [vmem:[#allocation5 + $0x4d8] sm:$0xff] }
  0xc2   :  { %v3497_v21 = vpack.c.bf16 %v2268_v50, %v2266_v49  ;;  %v1468_v25 = vsel %vm198_vm2, 1.0, %v2206_v22  ;;  %v1484_v45 = vsel %vm265_vm3, 1.0, %v2206_v22  ;;  %vm66_vm5 = vcmp.eq.s32.totalorder %v2477_v34, %v2331_v16 }
  0xc3   :  { %vm200_vm6 = vcmp.eq.s32.totalorder %v2475_v33, %v2331_v16  ;;  %v578_v1 = vadd.f32 %v1545_v12, %v511_v40  ;;  %v246_v46 = vadd.f32 %v1468_v25, %v179_v35  ;;  %vm399_vm7 = vcmp.eq.s32.totalorder %v2547_v3, %v2328_v15 }
  0xc4   :  { %1906 = vmatpush3.bf16.msra.mxu0 %v3497_v21  ;;  %vm466_vm8 = vcmp.eq.s32.totalorder %v2569_v38, %v2328_v15  ;;  %v3498_v49 = vpack.c.bf16 %v2276_v54, %v2274_v53  ;;  %v1500_v50 = vsel %vm332_vm4, 1.0, %v2206_v22  ;;  %vm533_vm9 = vcmp.eq.s32.totalorder %v2591_v47, %v2328_v15 }
  0xc5   :  { %vm133_vm10 = vcmp.eq.s32.totalorder %v2517_v26, %v2331_v16  ;;  %vm267_vm11 = vcmp.eq.s32.totalorder %v2515_v31, %v2331_v16  ;;  %983 = vmatmul.mubr.f32.vlgmr.msra.gmra.mrb[0].mxu1 %v578_v1  ;;  %v313_v37 = vadd.f32 %v1484_v45, %v246_v46  ;;  %v1438_v24 = vsel %vm66_vm5, 1.0, %v2206_v22  ;;  %v3506_v46 = vld [vmem:[#allocation14_spill] sm:$0xff] }
  0xc6   :  { %1908 = vmatprep.subr.bf16.mxu0 %v3498_v49  ;;  %v1454_v59 = vsel %vm133_vm10, 1.0, %v2206_v22  ;;  %vm334_vm12 = vcmp.eq.s32.totalorder %v2545_v55, %v2331_v16  ;;  %v3499_v53 = vpack.c.bf16 %v2272_v52, %v2270_v51  ;;  %v1516_v54 = vsel %vm399_vm7, 1.0, %v2206_v22  ;;  %v3501_v52 = vld [vmem:[#allocation11_spill] sm:$0xff] }
  0xc7   :  { %v1532_v13 = vsel %vm466_vm8, 1.0, %v2206_v22  ;;  %v181_v11 = vadd.f32 %v1454_v59, %v1438_v24  ;;  %v1470_v12 = vsel %vm200_vm6, 1.0, %v2206_v22  ;;  %v3500_v6 = vpack.c.bf16 %v2284_v58, %v2282_v57  ;;  %v3504_v57 = vld [vmem:[#allocation21_spill] sm:$0xff]  ;;  %v3509_v59 = vld [vmem:[#allocation12_spill] sm:$0xff] }
  0xc8   :  { %1938 = vmatpush3.bf16.msra.mxu1 %v3499_v53  ;;  %v380_v44 = vadd.f32 %v1500_v50, %v313_v37  ;;  %v1486_v40 = vsel %vm267_vm11, 1.0, %v2206_v22  ;;  %v1502_v51 = vsel %vm334_vm12, 1.0, %v2206_v22  ;;  %vm401_vm13 = vcmp.eq.s32.totalorder %v2547_v3, %v2331_v16  ;;  %v3508_v24 = vld [vmem:[#allocation13_spill] sm:$0xff] }
  0xc9   :  { %1910 = vmatpush3.bf16.msra.mxu0 %v3500_v6  ;;  %v3502_v35 = vpack.c.bf16 %v2280_v56, %v3501_v52  ;;  %v3503_v21 = vpack.c.bf16 %v2295_v63, %v2293_v62  ;;  %v248_v25 = vadd.f32 %v1470_v12, %v181_v11  ;;  %vm468_vm14 = vcmp.eq.s32.totalorder %v2569_v38, %v2331_v16  ;;  %v2723_v11 = vld [vmem:[#allocation5 + $0x590] sm:$0xff]  ;;  %v2725_v12 = vld [vmem:[#allocation5 + $0x598] sm:$0xff] }
  0xca   :  { %vm63_vm15 = vcmp.eq.s32.totalorder %v2477_v34, %v3504_v57  ;;  %vm130_vm0 = vcmp.eq.s32.totalorder %v2517_v26, %v3504_v57  ;;  %v447_v58 = vadd.f32 %v1516_v54, %v380_v44  ;;  %vm197_vm1 = vcmp.eq.s32.totalorder %v2475_v33, %v3504_v57  ;;  %v3512_v44 = vld [vmem:[#allocation26_spill] sm:$0xff]  ;;  %v3514_v52 = vld [vmem:[#allocation17_spill] sm:$0xff] }
  0xcb   :  { %1940 = vmatprep.subr.bf16.mxu1 %v3502_v35  ;;  %1912 = vmatprep.subr.bf16.mxu0 %v3503_v21  ;;  %v1435_v45 = vsel %vm63_vm15, 1.0, %v2206_v22  ;;  %v1451_v56 = vsel %vm130_vm0, 1.0, %v2206_v22  ;;  %v1548_v62 = vsel %vm533_vm9, 1.0, %v2206_v22  ;;  %v315_v63 = vadd.f32 %v1486_v40, %v248_v25  ;;  %v2739_v25 = vld [vmem:[#allocation5 + $0x410] sm:$0xff] }
  0xcc   :  { %v3505_v1 = vpack.c.bf16 %v2291_v61, %v2289_v60  ;;  %v3507_v49 = vpack.c.bf16 %v2303_v4, %v3506_v46  ;;  %v178_v50 = vadd.f32 %v1451_v56, %v1435_v45  ;;  %vm264_vm2 = vcmp.eq.s32.totalorder %v2515_v31, %v3504_v57 }
  0xcd   :  { %v514_v37 = vadd.f32 %v1532_v13, %v447_v58  ;;  %v1518_v15 = vsel %vm401_vm13, 1.0, %v2206_v22  ;;  %v3510_v53 = vpack.c.bf16 %v3508_v24, %v3509_v59  ;;  %v3511_v60 = vpack.c.bf16 %v2317_v10, %v2315_v9  ;;  %v2741_v58 = vld [vmem:[#allocation5 + $0x418] sm:$0xff] }
  0xce   :  { %1942 = vmatpush3.bf16.msra.mxu1 %v3505_v1  ;;  %1914 = vmatpush3.bf16.msra.mxu0 %v3507_v49  ;;  %v1467_v61 = vsel %vm197_vm1, 1.0, %v2206_v22  ;;  %vm331_vm3 = vcmp.eq.s32.totalorder %v2545_v55, %v3504_v57  ;;  %v382_v4 = vadd.f32 %v1502_v51, %v315_v63  ;;  %v1534_v54 = vsel %vm468_vm14, 1.0, %v2206_v22  ;;  %v2759_v63 = vld [vmem:[#allocation5 + $0x510] sm:$0xff]  ;;  %v2761_v1 = vld [vmem:[#allocation5 + $0x518] sm:$0xff] }
  0xcf   :  { %1944 = vmatprep.subr.bf16.mxu1 %v3510_v53  ;;  %1916 = vmatprep.subr.bf16.mxu0 %v3511_v60  ;;  %vm535_vm4 = vcmp.eq.s32.totalorder %v2591_v47, %v2331_v16  ;;  %v245_v13 = vadd.f32 %v1467_v61, %v178_v50  ;;  %v581_v9 = vadd.f32 %v1548_v62, %v514_v37  ;;  %v1483_v10 = vsel %vm264_vm2, 1.0, %v2206_v22  ;;  %v3521_v53 = vld [vmem:[#allocation20_spill] sm:$0xff] }
  0xd0   :  { %v1499_v6 = vsel %vm331_vm3, 1.0, %v2206_v22  ;;  %vm65_vm5 = vcmp.eq.s32.totalorder %v2477_v34, %v3512_v44  ;;  %v449_v40 = vadd.f32 %v1518_v15, %v382_v4  ;;  %v3513_v51 = vpack.c.bf16 %v2313_v8, %v2311_v7  ;;  %v3516_v8 = vld [vmem:[#allocation16_spill] sm:$0xff] }
  0xd1   :  { %v3515_v35 = vpack.c.bf16 %v2325_v14, %v3514_v52  ;;  %v312_v21 = vadd.f32 %v1483_v10, %v245_v13  ;;  %vm398_vm6 = vcmp.eq.s32.totalorder %v2547_v3, %v3504_v57  ;;  %v2744_v45 = vadd.s32 1024, %v2264_v48  ;;  %1052 = vmatprep.mubr.f32.mxu0 %v581_v9  ;;  %v3517_v14 = vld [vmem:[#allocation15_spill] sm:$0xff]  ;;  %v3524_v13 = vld [vmem:[#allocation18_spill] sm:$0xff]  ;;  %v3529_v52 = vld [vmem:[#allocation25_spill] sm:$0xff] }
  0xd2   :  { %1946 = vmatpush3.bf16.msra.mxu1 %v3513_v51  ;;  %v1550_v7 = vsel %vm535_vm4, 1.0, %v2206_v22  ;;  %v3518_v56 = vpack.c.bf16 %v3516_v8, %v3517_v14  ;;  %vm132_vm7 = vcmp.eq.s32.totalorder %v2517_v26, %v3512_v44  ;;  %vm199_vm8 = vcmp.eq.s32.totalorder %v2475_v33, %v3512_v44 }
  0xd3   :  { %1918 = vmatpush3.bf16.msra.mxu0 %v3515_v35  ;;  %v2003_v62 = vpack.c.bf16 %v2725_v12, %v2723_v11  ;;  %v516_v46 = vadd.f32 %v1534_v54, %v449_v40  ;;  %v3519_v16 = vpack.c.bf16 %v2339_v20, %v2337_v19  ;;  %v379_v49 = vadd.f32 %v1499_v6, %v312_v21  ;;  %v3523_v54 = vld [vmem:[#allocation19_spill] sm:$0xff]  ;;  %v3530_v35 = vld [vmem:[#allocation24_spill] sm:$0xff] }
  0xd4   :  { %1948 = vmatprep.subr.bf16.mxu1 %v3518_v56  ;;  %v1437_v50 = vsel %vm65_vm5, 1.0, %v2206_v22  ;;  %v1453_v37 = vsel %vm132_vm7, 1.0, %v2206_v22  ;;  %v1515_v15 = vsel %vm398_vm6, 1.0, %v2206_v22  ;;  %vm266_vm9 = vcmp.eq.s32.totalorder %v2515_v31, %v3512_v44  ;;  %v3532_v56 = vld [vmem:[#allocation23_spill] sm:$0xff] }
  0xd5   :  { %1920 = vmatprep.subr.bf16.mxu0 %v3519_v16  ;;  %v180_v24 = vadd.f32 %v1453_v37, %v1437_v50  ;;  %v1973_v19 = vpack.c.bf16 %v2741_v58, %v2739_v25  ;;  %v583_v20 = vadd.f32 %v1550_v7, %v516_v46  ;;  %v3520_v59 = vpack.c.bf16 %v2335_v18, %v2333_v17  ;;  %v3533_v46 = vld [vmem:[#allocation22_spill] sm:$0xff]  ;;  %v3058_v58 = vld [vmem:[#allocation5 + $0x4e8] sm:$0xff] }
  0xd6   :  { %v3522_v60 = vpack.c.bf16 %v2347_v23, %v3521_v53  ;;  %vm465_vm10 = vcmp.eq.s32.totalorder %v2569_v38, %v3504_v57  ;;  %v1469_v61 = vsel %vm199_vm8, 1.0, %v2206_v22  ;;  %v2005_v4 = vpack.c.bf16 %v2761_v1, %v2759_v63  ;;  %v3539_v53 = vld [vmem:[#allocation31_spill] sm:$0xff]  ;;  %v3056_v25 = vld [vmem:[#allocation5 + $0x4e0] sm:$0xff] }
  0xd7   :  { %1950 = vmatpush3.bf16.msra.mxu1 %v3520_v59  ;;  %v3525_v9 = vpack.c.bf16 %v3523_v54, %v3524_v13  ;;  %v3526_v17 = vpack.c.bf16 %v2362_v30, %v2360_v29  ;;  %vm532_vm11 = vcmp.eq.s32.totalorder %v2591_v47, %v3504_v57  ;;  %v247_v18 = vadd.f32 %v1469_v61, %v180_v24  ;;  %v3527_v29 = vld [vmem:[#allocation27_spill] sm:$0xff]  ;;  %v3536_v24 = vld [vmem:[#allocation28_spill] sm:$0xff]  ;;  %v3541_v54 = vld [vmem:[#allocation33_spill] sm:$0xff] }
  0xd8   :  { %1922 = vmatpush3.bf16.msra.mxu0 %v3522_v60  ;;  %vm333_vm12 = vcmp.eq.s32.totalorder %v2545_v55, %v3512_v44  ;;  %v2804_v23 = vadd.s32 1280, %v2264_v48  ;;  %1122 = vmatprep.mubr.f32.mxu1 %v583_v20  ;;  %v446_v10 = vadd.f32 %v1515_v15, %v379_v49  ;;  %v1485_v6 = vsel %vm266_vm9, 1.0, %v2206_v22  ;;  %v3538_v59 = vld [vmem:[#allocation32_spill] sm:$0xff]  ;;  %v3542_v13 = vld [vmem:[#allocation30_spill] sm:$0xff] }
  0xd9   :  { %1952 = vmatprep.subr.bf16.mxu1 %v3525_v9  ;;  %1924 = vmatprep.subr.bf16.mxu0 %v3526_v17  ;;  %vm400_vm13 = vcmp.eq.s32.totalorder %v2547_v3, %v3512_v44  ;;  %vm68_vm14 = vcmp.eq.s32.totalorder %v2477_v34, %v3527_v29  ;;  %v1531_v30 = vsel %vm465_vm10, 1.0, %v2206_v22  ;;  %v314_v40 = vadd.f32 %v1485_v6, %v247_v18  ;;  %v3543_v9 = vld [vmem:[#allocation29_spill] sm:$0xff]  ;;  %v3546_v18 = vld [vmem:[#allocation36_spill] sm:$0xff] }
  0xda   :  { %vm135_vm15 = vcmp.eq.s32.totalorder %v2517_v26, %v3527_v29  ;;  %vm202_vm0 = vcmp.eq.s32.totalorder %v2475_v33, %v3527_v29  ;;  %v3528_v51 = vpack.c.bf16 %v2358_v28, %v2356_v27  ;;  %v3531_v21 = vpack.c.bf16 %v3529_v52, %v3530_v35 }
  0xdb   :  { %v1501_v7 = vsel %vm333_vm12, 1.0, %v2206_v22  ;;  %v1440_v8 = vsel %vm68_vm14, 1.0, %v2206_v22  ;;  %v1456_v14 = vsel %vm135_vm15, 1.0, %v2206_v22  ;;  %vm269_vm1 = vcmp.eq.s32.totalorder %v2515_v31, %v3527_v29 }
  0xdc   :  { %1954 = vmatpush3.bf16.msra.mxu1 %v3528_v51  ;;  %1926 = vmatpush3.bf16.msra.mxu0 %v3531_v21  ;;  %v3534_v16 = vpack.c.bf16 %v3532_v56, %v3533_v46  ;;  %v3535_v27 = vpack.c.bf16 %v2390_v43, %v2388_v42  ;;  %v1547_v28 = vsel %vm532_vm11, 1.0, %v2206_v22  ;;  %v1517_v49 = vsel %vm400_vm13, 1.0, %v2206_v22  ;;  %v2889_v56 = vld [vmem:[#allocation5 + $0x5a0] sm:$0xff]  ;;  %v3548_v46 = vld [vmem:[#allocation35_spill] sm:$0xff] }
  0xdd   :  { %v183_v50 = vadd.f32 %v1456_v14, %v1440_v8  ;;  %vm336_vm2 = vcmp.eq.s32.totalorder %v2545_v55, %v3527_v29  ;;  %v513_v37 = vadd.f32 %v1531_v30, %v446_v10  ;;  %vm467_vm3 = vcmp.eq.s32.totalorder %v2569_v38, %v3512_v44  ;;  %v2885_v8 = vld [vmem:[#allocation5 + $0x4a0] sm:$0xff]  ;;  %v2887_v14 = vld [vmem:[#allocation5 + $0x4a8] sm:$0xff] }
  0xde   :  { %1956 = vmatprep.subr.bf16.mxu1 %v3534_v16  ;;  %1928 = vmatprep.subr.bf16.mxu0 %v3535_v27  ;;  %vm534_vm4 = vcmp.eq.s32.totalorder %v2591_v47, %v3512_v44  ;;  %v1472_v42 = vsel %vm202_vm0, 1.0, %v2206_v22  ;;  %v381_v43 = vadd.f32 %v1501_v7, %v314_v40  ;;  %v1488_v15 = vsel %vm269_vm1, 1.0, %v2206_v22  ;;  %v3549_v16 = vld [vmem:[#allocation34_spill] sm:$0xff] }
  0xdf   :  { %v250_v57 = vadd.f32 %v1472_v42, %v183_v50  ;;  %vm403_vm5 = vcmp.eq.s32.totalorder %v2547_v3, %v3527_v29  ;;  %v3537_v20 = vpack.c.bf16 %v2386_v41, %v3536_v24  ;;  %v3540_v60 = vpack.c.bf16 %v3538_v59, %v3539_v53  ;;  %v3545_v41 = vld [vmem:[#allocation37_spill] sm:$0xff]  ;;  %v3552_v42 = vld [vmem:[#allocation40_spill] sm:$0xff]  ;;  %v2907_v24 = vld [vmem:[#allocation5 + $0x5a8] sm:$0xff] }
  0xe0   :  { %v1504_v61 = vsel %vm336_vm2, 1.0, %v2206_v22  ;;  %vm70_vm6 = vcmp.eq.s32.totalorder %v2477_v34, %v3541_v54  ;;  %vm137_vm7 = vcmp.eq.s32.totalorder %v2517_v26, %v3541_v54  ;;  %vm204_vm8 = vcmp.eq.s32.totalorder %v2475_v33, %v3541_v54  ;;  %v3551_v50 = vld [vmem:[#allocation41_spill] sm:$0xff]  ;;  %v2911_v59 = vld [vmem:[#allocation5 + $0x428] sm:$0xff] }
  0xe1   :  { %1958 = vmatpush3.bf16.msra.mxu1 %v3537_v20  ;;  %1930 = vmatpush3.bf16.msra.mxu0 %v3540_v60  ;;  %v3544_v17 = vpack.c.bf16 %v3542_v13, %v3543_v9  ;;  %v3547_v10 = vpack.c.bf16 %v3545_v41, %v3546_v18  ;;  %v317_v6 = vadd.f32 %v1488_v15, %v250_v57  ;;  %v1442_v30 = vsel %vm70_vm6, 1.0, %v2206_v22  ;;  %v2909_v20 = vld [vmem:[#allocation5 + $0x420] sm:$0xff]  ;;  %v3554_v53 = vld [vmem:[#allocation39_spill] sm:$0xff]  ;;  %v3557_v9 = vld [vmem:[#allocation45_spill] sm:$0xff] }
  0xe2   :  { %vm470_vm9 = vcmp.eq.s32.totalorder %v2569_v38, %v3527_v29  ;;  %v1458_v40 = vsel %vm137_vm7, 1.0, %v2206_v22  ;;  %v1520_v51 = vsel %vm403_vm5, 1.0, %v2206_v22  ;;  %vm271_vm10 = vcmp.eq.s32.totalorder %v2515_v31, %v3541_v54  ;;  %v3555_v60 = vld [vmem:[#allocation38_spill] sm:$0xff] }
  0xe3   :  { %1960 = vmatprep.subr.bf16.mxu1 %v3544_v17  ;;  %1932 = vmatprep.subr.bf16.mxu0 %v3547_v10  ;;  %v185_v52 = vadd.f32 %v1458_v40, %v1442_v30  ;;  %vm338_vm11 = vcmp.eq.s32.totalorder %v2545_v55, %v3541_v54  ;;  %v448_v35 = vadd.f32 %v1517_v49, %v381_v43  ;;  %v1474_v7 = vsel %vm204_vm8, 1.0, %v2206_v22  ;;  %v3558_v17 = vld [vmem:[#allocation44_spill] sm:$0xff]  ;;  %v2927_v30 = vld [vmem:[#allocation5 + $0x520] sm:$0xff]  ;;  %v2929_v40 = vld [vmem:[#allocation5 + $0x528] sm:$0xff] }
  0xe4   :  { %v384_v21 = vadd.f32 %v1504_v61, %v317_v6  ;;  %vm537_vm12 = vcmp.eq.s32.totalorder %v2591_v47, %v3527_v29  ;;  %v3550_v27 = vpack.c.bf16 %v3548_v46, %v3549_v16  ;;  %v3553_v57 = vpack.c.bf16 %v3551_v50, %v3552_v42  ;;  %v2947_v46 = vld [vmem:[#allocation5 + $0x5b8] sm:$0xff]  ;;  %v2949_v16 = vld [vmem:[#allocation5 + $0x430] sm:$0xff] }
  0xe5   :  { %v1533_v49 = vsel %vm467_vm3, 1.0, %v2206_v22  ;;  %v1536_v43 = vsel %vm470_vm9, 1.0, %v2206_v22  ;;  %v252_v15 = vadd.f32 %v1474_v7, %v185_v52  ;;  %vm405_vm13 = vcmp.eq.s32.totalorder %v2547_v3, %v3541_v54  ;;  %v2945_v7 = vld [vmem:[#allocation5 + $0x5b0] sm:$0xff] }
  0xe6   :  { %1962 = vmatpush3.bf16.msra.mxu1 %v3550_v27  ;;  %1934 = vmatpush3.bf16.msra.mxu0 %v3553_v57  ;;  %v3556_v61 = vpack.c.bf16 %v3554_v53, %v3555_v60  ;;  %v580_v13 = vadd.f32 %v1547_v28, %v513_v37  ;;  %v3559_v41 = vpack.c.bf16 %v3557_v9, %v3558_v17  ;;  %v1490_v10 = vsel %vm271_vm10, 1.0, %v2206_v22  ;;  %v2931_v28 = vld [vmem:[#allocation5 + $0x4b0] sm:$0xff]  ;;  %v2933_v37 = vld [vmem:[#allocation5 + $0x4b8] sm:$0xff]  ;;  %v2963_v53 = vld [vmem:[#allocation5 + $0x4c0] sm:$0xff] }
  0xe7   :  { %v451_v18 = vadd.f32 %v1520_v51, %v384_v21  ;;  %v1506_v6 = vsel %vm338_vm11, 1.0, %v2206_v22  ;;  %v1549_v51 = vsel %vm534_vm4, 1.0, %v2206_v22  ;;  %v1552_v52 = vsel %vm537_vm12, 1.0, %v2206_v22  ;;  %v2951_v27 = vld [vmem:[#allocation5 + $0x438] sm:$0xff]  ;;  %v2959_v57 = vld [vmem:[#allocation5 + $0x530] sm:$0xff]  ;;  %v3560_v60 = vld [vmem:[#allocation43_spill] sm:$0xff] }
  0xe8   :  { %1964 = vmatprep.subr.bf16.mxu1 %v3556_v61  ;;  %1968 = vmatprep.subr.bf16.mxu0 %v3559_v41  ;;  %v319_v21 = vadd.f32 %v1490_v10, %v252_v15  ;;  %vm472_vm14 = vcmp.eq.s32.totalorder %v2569_v38, %v3541_v54  ;;  %v515_v44 = vadd.f32 %v1533_v49, %v448_v35  ;;  %v1522_v29 = vsel %vm405_vm13, 1.0, %v2206_v22  ;;  %v2961_v15 = vld [vmem:[#allocation5 + $0x538] sm:$0xff]  ;;  %v3561_v61 = vld [vmem:[#allocation42_spill] sm:$0xff]  ;;  %v3564_v49 = vld [vmem:[#allocation48_spill] sm:$0xff] }
  0xe9   :  { %1053 = vmatmul.mubr.f32.vlgmr.msra.gmra.mrb[2].mxu0 %v580_v13  ;;  %v518_v50 = vadd.f32 %v1536_v43, %v451_v18  ;;  %v1975_v42 = vpack.c.bf16 %v2887_v14, %v2885_v8  ;;  %v3562_v9 = vpack.c.bf16 %v3560_v60, %v3561_v61  ;;  %v3563_v35 = vld [vmem:[#allocation49_spill] sm:$0xff]  ;;  %vm539_vm15 = vcmp.eq.s32.totalorder %v2591_v47, %v3541_v54  ;;  %v2975_v14 = vld [vmem:[#allocation5 + $0x4c8] sm:$0xff]  ;;  %v2977_v17 = vld [vmem:[#allocation5 + $0x5c0] sm:$0xff] }
  0xea   :  { %v3565_v43 = vpack.c.bf16 %v3563_v35, %v3564_v49  ;;  %v386_v13 = vadd.f32 %v1506_v6, %v319_v21  ;;  %v2007_v8 = vpack.c.bf16 %v2907_v24, %v2889_v56  ;;  %v2979_v41 = vld [vmem:[#allocation5 + $0x5c8] sm:$0xff]  ;;  %v2982_v18 = vadd.s32 1664, %v2264_v48  ;;  %v3567_v61 = vld [vmem:[#allocation46_spill] sm:$0xff]  ;;  %v3120_v56 = vld [vmem:[#allocation5 + $0x4f8] sm:$0xff] }
  0xeb   :  { %1966 = vmatpush3.bf16.msra.mxu1 %v3562_v9  ;;  %v582_v10 = vadd.f32 %v1549_v51, %v515_v44  ;;  %v3566_v60 = vld [vmem:[#allocation47_spill] sm:$0xff]  ;;  %v585_v6 = vadd.f32 %v1552_v52, %v518_v50  ;;  %v1538_v21 = vsel %vm472_vm14, 1.0, %v2206_v22  ;;  %v1977_v35 = vpack.c.bf16 %v2911_v59, %v2909_v20  ;;  %v2996_v49 = vld [vmem:[#allocation5 + $0x440] sm:$0xff]  ;;  %v3122_v24 = vld [vmem:[#allocation5 + $0x5f0] sm:$0xff] }
  0xec   :  { %1970 = vmatpush3.bf16.msra.mxu0 %v3565_v43  ;;  %v3568_v9 = vpack.c.bf16 %v3566_v60, %v3567_v61  ;;  %v2998_v51 = vld [vmem:[#allocation5 + $0x448] sm:$0xff]  ;;  %v3000_v44 = vld [vmem:[#allocation5 + $0x540] sm:$0xff]  ;;  %v453_v43 = vadd.f32 %v1522_v29, %v386_v13  ;;  %v2009_v52 = vpack.c.bf16 %v2929_v40, %v2927_v30  ;;  %v1979_v50 = vpack.c.bf16 %v2933_v37, %v2931_v28  ;;  %v3024_v37 = vld [vmem:[#allocation5 + $0x5d0] sm:$0xff] }
  0xed   :  { %1972 = vmatprep.subr.bf16.mxu0 %v1971_v39  ;;  %v3006_v60 = vld [vmem:[#allocation5 + $0x548] sm:$0xff]  ;;  %vm134_vm0 = vcmp.eq.s32.totalorder %v2517_v26, %v2744_v45  ;;  %1192 = vmatprep.mubr.f32.mxu0 %v585_v6  ;;  %v1554_v39 = vsel %vm539_vm15, 1.0, %v2206_v22  ;;  %v2011_v20 = vpack.c.bf16 %v2947_v46, %v2945_v7  ;;  %v1981_v59 = vpack.c.bf16 %v2951_v27, %v2949_v16  ;;  %v3026_v29 = vld [vmem:[#allocation5 + $0x5d8] sm:$0xff]  ;;  %v3028_v13 = vld [vmem:[#allocation5 + $0x450] sm:$0xff] }
  0xee   :  { %2000 = vmatprep.subr.bf16.mxu1 %v3568_v9  ;;  %1123 = vmatmul.mubr.f32.vlgmr.msra.gmra.mrb[2].mxu1 %v582_v10  ;;  %v520_v54 = vadd.f32 %v1538_v21, %v453_v43  ;;  %v1983_v10 = vpack.c.bf16 %v2975_v14, %v2963_v53  ;;  %v3038_v61 = vld [vmem:[#allocation5 + $0x458] sm:$0xff]  ;;  %v3040_v9 = vld [vmem:[#allocation5 + $0x550] sm:$0xff]  ;;  %vm67_vm1 = vcmp.eq.s32.totalorder %v2477_v34, %v2744_v45  ;;  %v3047_v0 = vadd.s32 1920, %v2264_v48  ;;  %v3074_v43 = vld [vmem:[#allocation5 + $0x460] sm:$0xff] }
  0xef   :  { %2002 = vmatpush3.bf16.msra.mxu1 %v2001_v36  ;;  %v3042_v6 = vld [vmem:[#allocation5 + $0x558] sm:$0xff]  ;;  %v1455_v21 = vsel %vm134_vm0, 1.0, %v2206_v22  ;;  %vm136_vm2 = vcmp.eq.s32.totalorder %v2517_v26, %v2804_v23  ;;  %v3076_v36 = vld [vmem:[#allocation5 + $0x468] sm:$0xff]  ;;  %vm201_vm3 = vcmp.eq.s32.totalorder %v2475_v33, %v2744_v45  ;;  %vm69_vm4 = vcmp.eq.s32.totalorder %v2477_v34, %v2804_v23 }
  0xf0   :  { %1974 = vmatpush3.bf16.msra.mxu0 %v1973_v19  ;;  %2004 = vmatprep.subr.bf16.mxu1 %v2003_v62  ;;  %v3060_v19 = vld [vmem:[#allocation5 + $0x5e0] sm:$0xff]  ;;  %v587_v11 = vadd.f32 %v1554_v39, %v520_v54  ;;  %v1439_v54 = vsel %vm67_vm1, 1.0, %v2206_v22  ;;  %v1457_v62 = vsel %vm136_vm2, 1.0, %v2206_v22  ;;  %vm72_vm5 = vcmp.eq.s32.totalorder %v2477_v34, %v2982_v18 }
  0xf1   :  { %1976 = vmatprep.subr.bf16.mxu0 %v1975_v42  ;;  %v3072_v42 = vld [vmem:[#allocation5 + $0x5e8] sm:$0xff]  ;;  %v182_v39 = vadd.f32 %v1455_v21, %v1439_v54  ;;  %v3112_v21 = vld [vmem:[#allocation5 + $0x4f0] sm:$0xff]  ;;  %v1471_v54 = vsel %vm201_vm3, 1.0, %v2206_v22  ;;  %vm268_vm6 = vcmp.eq.s32.totalorder %v2515_v31, %v2744_v45  ;;  %vm203_vm7 = vcmp.eq.s32.totalorder %v2475_v33, %v2804_v23 }
  0xf2   :  { %1262 = vmatprep.mubr.f32.mxu1 %v587_v11  ;;  %v3110_v11 = vld [vmem:[#allocation5 + $0x568] sm:$0xff]  ;;  %vm139_vm8 = vcmp.eq.s32.totalorder %v2517_v26, %v2982_v18  ;;  %v1444_v1 = vsel %vm72_vm5, 1.0, %v2206_v22  ;;  %vm206_vm9 = vcmp.eq.s32.totalorder %v2475_v33, %v2982_v18  ;;  %vm335_vm10 = vcmp.eq.s32.totalorder %v2545_v55, %v2744_v45 }
  0xf3   :  { %2006 = vmatpush3.bf16.msra.mxu1 %v2005_v4  ;;  %v3108_v4 = vld [vmem:[#allocation5 + $0x560] sm:$0xff]  ;;  %v1460_v63 = vsel %vm139_vm8, 1.0, %v2206_v22  ;;  %v249_v2 = vadd.f32 %v1471_v54, %v182_v39  ;;  %v1995_v30 = vpack.c.bf16 %v3120_v56, %v3112_v21  ;;  %vm402_vm11 = vcmp.eq.s32.totalorder %v2547_v3, %v2744_v45  ;;  %v802_v56 = vld [vmem:[#allocation5 + $0x690] sm:$0xff] }
  0xf4   :  { %2008 = vmatprep.subr.bf16.mxu1 %v2007_v8  ;;  %1978 = vmatpush3.bf16.msra.mxu0 %v1977_v35  ;;  %v3124_v8 = vld [vmem:[#allocation5 + $0x5f8] sm:$0xff]  ;;  %v1441_v35 = vsel %vm69_vm4, 1.0, %v2206_v22  ;;  %v2025_v12 = vpack.c.bf16 %v3110_v11, %v3108_v4  ;;  %v187_v28 = vadd.f32 %v1460_v63, %v1444_v1  ;;  %v1473_v7 = vsel %vm203_vm7, 1.0, %v2206_v22  ;;  %v816_v4 = vld [vmem:[#allocation5 + $0x700] sm:$0xff]  ;;  %v817_v11 = vld [vmem:[#allocation5 + $0x708] sm:$0xff] }
  0xf5   :  { %1980 = vmatprep.subr.bf16.mxu0 %v1979_v50  ;;  %v184_v50 = vadd.f32 %v1457_v62, %v1441_v35  ;;  %v2027_v40 = vpack.c.bf16 %v3124_v8, %v3122_v24  ;;  %v1476_v62 = vsel %vm206_vm9, 1.0, %v2206_v22  ;;  %vm273_vm12 = vcmp.eq.s32.totalorder %v2515_v31, %v2982_v18 }
  0xf6   :  { %v254_v46 = vadd.f32 %v1476_v62, %v187_v28  ;;  %v1503_v16 = vsel %vm335_vm10, 1.0, %v2206_v22  ;;  %vm270_vm13 = vcmp.eq.s32.totalorder %v2515_v31, %v2804_v23  ;;  %vm74_vm14 = vcmp.eq.s32.totalorder %v2477_v34, %v3047_v0 }
  0xf7   :  { %2010 = vmatpush3.bf16.msra.mxu1 %v2009_v52  ;;  %v1487_v52 = vsel %vm268_vm6, 1.0, %v2206_v22  ;;  %v251_v27 = vadd.f32 %v1473_v7, %v184_v50  ;;  %v3569_v53 = vpack.c.bf16 %v2961_v15, %v2959_v57  ;;  %vm337_vm15 = vcmp.eq.s32.totalorder %v2545_v55, %v2804_v23 }
  0xf8   :  { %2012 = vmatprep.subr.bf16.mxu1 %v2011_v20  ;;  %1982 = vmatpush3.bf16.msra.mxu0 %v1981_v59  ;;  %v316_v14 = vadd.f32 %v1487_v52, %v249_v2  ;;  %vm340_vm0 = vcmp.eq.s32.totalorder %v2545_v55, %v2982_v18  ;;  %vm141_vm1 = vcmp.eq.s32.totalorder %v2517_v26, %v3047_v0  ;;  %v1492_v57 = vsel %vm273_vm12, 1.0, %v2206_v22 }
  0xf9   :  { %1984 = vmatprep.subr.bf16.mxu0 %v1983_v10  ;;  %v3570_v20 = vpack.c.bf16 %v2979_v41, %v2977_v17  ;;  %v3571_v59 = vpack.c.bf16 %v2998_v51, %v2996_v49  ;;  %v1446_v15 = vsel %vm74_vm14, 1.0, %v2206_v22  ;;  %v1462_v28 = vsel %vm141_vm1, 1.0, %v2206_v22 }
  0xfa   :  { %vm208_vm2 = vcmp.eq.s32.totalorder %v2475_v33, %v3047_v0  ;;  %v3572_v10 = vpack.c.bf16 %v3010_v32, %v3008_v5  ;;  %v1489_v17 = vsel %vm270_vm13, 1.0, %v2206_v22  ;;  %v321_v41 = vadd.f32 %v1492_v57, %v254_v46  ;;  %v734_v5 = vld [vmem:[#allocation5 + $0x470] sm:$0xff]  ;;  %v735_v32 = vld [vmem:[#allocation5 + $0x478] sm:$0xff] }
  0xfb   :  { %2014 = vmatpush3.bf16.msra.mxu1 %v3569_v53  ;;  %v189_v2 = vadd.f32 %v1462_v28, %v1446_v15  ;;  %vm275_vm3 = vcmp.eq.s32.totalorder %v2515_v31, %v3047_v0  ;;  %v318_v49 = vadd.f32 %v1489_v17, %v251_v27  ;;  %v1508_v51 = vsel %vm340_vm0, 1.0, %v2206_v22  ;;  %v800_v27 = vld [vmem:[#allocation5 + $0x680] sm:$0xff] }
  0xfc   :  { %2016 = vmatprep.subr.bf16.mxu1 %v3570_v20  ;;  %1986 = vmatpush3.bf16.msra.mxu0 %v3571_v59  ;;  %v1478_v39 = vsel %vm208_vm2, 1.0, %v2206_v22  ;;  %vm342_vm4 = vcmp.eq.s32.totalorder %v2545_v55, %v3047_v0  ;;  %v3573_v63 = vpack.c.bf16 %v3006_v60, %v3000_v44  ;;  %v383_v1 = vadd.f32 %v1503_v16, %v316_v14  ;;  %v832_v28 = vld [vmem:[#allocation5 + $0x780] sm:$0xff] }
  0xfd   :  { %1988 = vmatprep.subr.bf16.mxu0 %v3572_v10  ;;  %v1505_v54 = vsel %vm337_vm15, 1.0, %v2206_v22  ;;  %vm407_vm5 = vcmp.eq.s32.totalorder %v2547_v3, %v2982_v18  ;;  %v256_v35 = vadd.f32 %v1478_v39, %v189_v2  ;;  %v3574_v50 = vpack.c.bf16 %v3026_v29, %v3024_v37  ;;  %v785_v10 = vld [vmem:[#allocation5 + $0x608] sm:$0xff] }
  0xfe   :  { %v3575_v44 = vpack.c.bf16 %v3038_v61, %v3028_v13  ;;  %v1519_v60 = vsel %vm402_vm11, 1.0, %v2206_v22  ;;  %vm404_vm6 = vcmp.eq.s32.totalorder %v2547_v3, %v2804_v23  ;;  %v1494_v52 = vsel %vm275_vm3, 1.0, %v2206_v22  ;;  %v3237_v13 = vld [vmem:[#allocation5 + $0x570] sm:$0xff]  ;;  %v3239_v61 = vld [vmem:[#allocation5 + $0x578] sm:$0xff] }
  0xff   :  { %2018 = vmatpush3.bf16.msra.mxu1 %v3573_v63  ;;  %v1510_v37 = vsel %vm342_vm4, 1.0, %v2206_v22  ;;  %v3576_v29 = vpack.c.bf16 %v3058_v58, %v3056_v25  ;;  %vm469_vm7 = vcmp.eq.s32.totalorder %v2569_v38, %v2744_v45  ;;  %v388_v62 = vadd.f32 %v1508_v51, %v321_v41  ;;  %v801_v25 = vld [vmem:[#allocation5 + $0x688] sm:$0xff] }
 0x100   :  { %2020 = vmatprep.subr.bf16.mxu1 %v3574_v50  ;;  %1990 = vmatpush3.bf16.msra.mxu0 %v3575_v44  ;;  %v323_v7 = vadd.f32 %v1494_v52, %v256_v35  ;;  %vm409_vm8 = vcmp.eq.s32.totalorder %v2547_v3, %v3047_v0  ;;  %v1997_v46 = vpack.c.bf16 %v735_v32, %v734_v5  ;;  %v1524_v58 = vsel %vm407_vm5, 1.0, %v2206_v22  ;;  %v834_v32 = vld [vmem:[#allocation5 + $0x790] sm:$0xff]  ;;  %v787_v35 = vld [vmem:[#allocation5 + $0x618] sm:$0xff]  ;;  %v805_v52 = vld [vmem:[#allocation5 + $0x6a8] sm:$0xff] }
 0x101   :  { %1992 = vmatprep.subr.bf16.mxu0 %v3576_v29  ;;  %vm536_vm9 = vcmp.eq.s32.totalorder %v2591_v47, %v2744_v45  ;;  %v385_v16 = vadd.f32 %v1505_v54, %v318_v49  ;;  %v3577_v53 = vpack.c.bf16 %v3042_v6, %v3040_v9  ;;  %v450_v14 = vadd.f32 %v1519_v60, %v383_v1  ;;  %v835_v54 = vld [vmem:[#allocation5 + $0x798] sm:$0xff]  ;;  %v804_v60 = vld [vmem:[#allocation5 + $0x6a0] sm:$0xff] }
 0x102   :  { %v1521_v20 = vsel %vm404_vm6, 1.0, %v2206_v22  ;;  %vm474_vm10 = vcmp.eq.s32.totalorder %v2569_v38, %v2982_v18  ;;  %v390_v59 = vadd.f32 %v1510_v37, %v323_v7  ;;  %v3578_v57 = vpack.c.bf16 %v3072_v42, %v3060_v19  ;;  %v833_v42 = vld [vmem:[#allocation5 + $0x788] sm:$0xff] }
 0x103   :  { %2022 = vmatpush3.bf16.msra.mxu1 %v3577_v53  ;;  %v3579_v15 = vpack.c.bf16 %v3076_v36, %v3074_v43  ;;  %v2029_v9 = vpack.c.bf16 %v3239_v61, %v3237_v13  ;;  %v1535_v6 = vsel %vm469_vm7, 1.0, %v2206_v22  ;;  %vm471_vm11 = vcmp.eq.s32.totalorder %v2569_v38, %v2804_v23  ;;  %v784_v43 = vld [vmem:[#allocation5 + $0x600] sm:$0xff] }
 0x104   :  { %2024 = vmatprep.subr.bf16.mxu1 %v3578_v57  ;;  %v1526_v19 = vsel %vm409_vm8, 1.0, %v2206_v22  ;;  %v2031_v36 = vpack.c.bf16 %v801_v25, %v800_v27  ;;  %v455_v17 = vadd.f32 %v1524_v58, %v388_v62  ;;  %vm541_vm12 = vcmp.eq.s32.totalorder %v2591_v47, %v2982_v18  ;;  %v786_v18 = vld [vmem:[#allocation5 + $0x610] sm:$0xff]  ;;  %v836_v27 = vld [vmem:[#allocation5 + $0x7a0] sm:$0xff]  ;;  %v837_v58 = vld [vmem:[#allocation5 + $0x7a8] sm:$0xff] }
 0x105   :  { %1994 = vmatpush3.bf16.msra.mxu0 %v3579_v15  ;;  %vm476_vm13 = vcmp.eq.s32.totalorder %v2569_v38, %v3047_v0  ;;  %v1551_v41 = vsel %vm536_vm9, 1.0, %v2206_v22  ;;  %v452_v2 = vadd.f32 %v1521_v20, %v385_v16  ;;  %vm538_vm14 = vcmp.eq.s32.totalorder %v2591_v47, %v2804_v23  ;;  %v819_v16 = vld [vmem:[#allocation5 + $0x718] sm:$0xff]  ;;  %v788_v53 = vld [vmem:[#allocation5 + $0x620] sm:$0xff]  ;;  %v806_v20 = vld [vmem:[#allocation5 + $0x6b0] sm:$0xff] }
 0x106   :  { %1996 = vmatprep.subr.bf16.mxu0 %v1995_v30  ;;  %v1540_v21 = vsel %vm474_vm10, 1.0, %v2206_v22  ;;  %v803_v30 = vld [vmem:[#allocation5 + $0x698] sm:$0xff]  ;;  %v517_v49 = vadd.f32 %v1535_v6, %v450_v14  ;;  %v1537_v45 = vsel %vm471_vm11, 1.0, %v2206_v22  ;;  %v457_v51 = vadd.f32 %v1526_v19, %v390_v59  ;;  %v789_v14 = vld [vmem:[#allocation5 + $0x628] sm:$0xff] }
 0x107   :  { %2026 = vmatpush3.bf16.msra.mxu1 %v2025_v12  ;;  %vm543_vm15 = vcmp.eq.s32.totalorder %v2591_v47, %v3047_v0  ;;  %v2063_v39 = vpack.c.bf16 %v833_v42, %v832_v28  ;;  %v2033_v63 = vpack.c.bf16 %v785_v10, %v784_v43  ;;  %v1556_v12 = vsel %vm541_vm12, 1.0, %v2206_v22  ;;  %v807_v59 = vld [vmem:[#allocation5 + $0x6b8] sm:$0xff]  ;;  %v820_v28 = vld [vmem:[#allocation5 + $0x720] sm:$0xff]  ;;  %v821_v19 = vld [vmem:[#allocation5 + $0x728] sm:$0xff] }
 0x108   :  { %2028 = vmatprep.subr.bf16.mxu1 %v2027_v40  ;;  %v1542_v5 = vsel %vm476_vm13, 1.0, %v2206_v22  ;;  %v584_v1 = vadd.f32 %v1551_v41, %v517_v49  ;;  %v1553_v24 = vsel %vm538_vm14, 1.0, %v2206_v22  ;;  %v522_v8 = vadd.f32 %v1540_v21, %v455_v17  ;;  %v839_v43 = vld [vmem:[#allocation5 + $0x7b8] sm:$0xff]  ;;  %v790_v10 = vld [vmem:[#allocation5 + $0x630] sm:$0xff]  ;;  %v808_v41 = vld [vmem:[#allocation5 + $0x6c0] sm:$0xff] }
 0x109   :  { %1998 = vmatpush3.bf16.msra.mxu0 %v1997_v46  ;;  %v2035_v40 = vpack.c.bf16 %v803_v30, %v802_v56  ;;  %v519_v50 = vadd.f32 %v1537_v45, %v452_v2  ;;  %v1558_v44 = vsel %vm543_vm15, 1.0, %v2206_v22  ;;  %v2065_v29 = vpack.c.bf16 %v817_v11, %v816_v4  ;;  %v818_v46 = vld [vmem:[#allocation5 + $0x710] sm:$0xff]  ;;  %v791_v17 = vld [vmem:[#allocation5 + $0x638] sm:$0xff]  ;;  %v809_v2 = vld [vmem:[#allocation5 + $0x6c8] sm:$0xff] }
 0x10a   :  { %2032 = vmatprep.subr.bf16.mxu0 %v2031_v36  ;;  %v589_v37 = vadd.f32 %v1556_v12, %v522_v8  ;;  %v524_v23 = vadd.f32 %v1542_v5, %v457_v51  ;;  %v3324_v13 = vadd.s32 1536, %v2264_v48  ;;  %v2067_v62 = vpack.c.bf16 %v835_v54, %v834_v32  ;;  %v838_v36 = vld [vmem:[#allocation5 + $0x7b0] sm:$0xff]  ;;  %v841_v4 = vld [vmem:[#allocation5 + $0x7c8] sm:$0xff]  ;;  %v792_v11 = vld [vmem:[#allocation5 + $0x640] sm:$0xff] }
 0x10b   :  { %2030 = vmatpush3.bf16.msra.mxu1 %v2029_v9  ;;  %v586_v61 = vadd.f32 %v1553_v24, %v519_v50  ;;  %v2037_v7 = vpack.c.bf16 %v787_v35, %v786_v18  ;;  %v2039_v25 = vpack.c.bf16 %v805_v52, %v804_v60  ;;  %v3329_v57 = vadd.s32 1792, %v2264_v48  ;;  %v822_v51 = vld [vmem:[#allocation5 + $0x730] sm:$0xff]  ;;  %v793_v5 = vld [vmem:[#allocation5 + $0x648] sm:$0xff]  ;;  %v811_v24 = vld [vmem:[#allocation5 + $0x6d8] sm:$0xff] }
 0x10c   :  { %1193 = vmatmul.mubr.f32.vlgmr.msra.gmra.mrb[4].mxu0 %v584_v1  ;;  %2064 = vmatprep.subr.bf16.mxu1 %v2063_v39  ;;  %v591_v0 = vadd.f32 %v1558_v44, %v524_v23  ;;  %vm138_vm0 = vcmp.eq.s32.totalorder %v2517_v26, %v3324_v13  ;;  %v2069_v15 = vpack.c.bf16 %v819_v16, %v818_v46  ;;  %v823_v39 = vld [vmem:[#allocation5 + $0x738] sm:$0xff]  ;;  %v810_v1 = vld [vmem:[#allocation5 + $0x6d0] sm:$0xff]  ;;  %v824_v50 = vld [vmem:[#allocation5 + $0x740] sm:$0xff] }
 0x10d   :  { %2034 = vmatpush3.bf16.msra.mxu0 %v2033_v63  ;;  %1332 = vmatprep.mubr.f32.mxu0 %v589_v37  ;;  %vm71_vm1 = vcmp.eq.s32.totalorder %v2477_v34, %v3324_v13  ;;  %v2071_v9 = vpack.c.bf16 %v837_v58, %v836_v27  ;;  %v2041_v6 = vpack.c.bf16 %v789_v14, %v788_v53  ;;  %v1459_v42 = vsel %vm138_vm0, 1.0, %v2206_v22  ;;  %v840_v63 = vld [vmem:[#allocation5 + $0x7c0] sm:$0xff]  ;;  %v825_v44 = vld [vmem:[#allocation5 + $0x748] sm:$0xff]  ;;  %v842_v60 = vld [vmem:[#allocation5 + $0x7d0] sm:$0xff] }
 0x10e   :  { %2036 = vmatprep.subr.bf16.mxu0 %v2035_v40  ;;  %1263 = vmatmul.mubr.f32.vlgmr.msra.gmra.mrb[4].mxu1 %v586_v61  ;;  %vm140_vm2 = vcmp.eq.s32.totalorder %v2517_v26, %v3329_v57  ;;  %v2043_v48 = vpack.c.bf16 %v807_v59, %v806_v20  ;;  %v1443_v21 = vsel %vm71_vm1, 1.0, %v2206_v22  ;;  %vm73_vm3 = vcmp.eq.s32.totalorder %v2477_v34, %v3329_v57  ;;  %v843_v37 = vld [vmem:[#allocation5 + $0x7d8] sm:$0xff]  ;;  %v844_v14 = vld [vmem:[#allocation5 + $0x7e0] sm:$0xff] }
 0x10f   :  { %2066 = vmatpush3.bf16.msra.mxu1 %v2065_v29  ;;  %1402 = vmatprep.mubr.f32.mxu1 %v591_v0  ;;  %v2073_v56 = vpack.c.bf16 %v821_v19, %v820_v28  ;;  %v186_v30 = vadd.f32 %v1459_v42, %v1443_v21  ;;  %vm205_vm4 = vcmp.eq.s32.totalorder %v2475_v33, %v3324_v13  ;;  %v1461_v26 = vsel %vm140_vm2, 1.0, %v2206_v22  ;;  %v794_v29 = vld [vmem:[#allocation5 + $0x650] sm:$0xff]  ;;  %v795_v23 = vld [vmem:[#allocation5 + $0x658] sm:$0xff] }
 0x110   :  { %2068 = vmatprep.subr.bf16.mxu1 %v2067_v62  ;;  %v2075_v49 = vpack.c.bf16 %v839_v43, %v838_v36  ;;  %v2045_v45 = vpack.c.bf16 %v791_v17, %v790_v10  ;;  %v2047_v12 = vpack.c.bf16 %v809_v2, %v808_v41  ;;  %v1445_v32 = vsel %vm73_vm3, 1.0, %v2206_v22  ;;  %v812_v62 = vld [vmem:[#allocation5 + $0x6e0] sm:$0xff]  ;;  %v827_v53 = vld [vmem:[#allocation5 + $0x758] sm:$0xff]  ;;  %v814_v19 = vld [vmem:[#allocation5 + $0x6f0] sm:$0xff] }
 0x111   :  { %2038 = vmatpush3.bf16.msra.mxu0 %v2037_v7  ;;  %v1475_v8 = vsel %vm205_vm4, 1.0, %v2206_v22  ;;  %v188_v40 = vadd.f32 %v1461_v26, %v1445_v32  ;;  %vm207_vm5 = vcmp.eq.s32.totalorder %v2475_v33, %v3329_v57  ;;  %v2077_v54 = vpack.c.bf16 %v823_v39, %v822_v51  ;;  %v813_v7 = vld [vmem:[#allocation5 + $0x6e8] sm:$0xff]  ;;  %v826_v33 = vld [vmem:[#allocation5 + $0x750] sm:$0xff]  ;;  %v815_v36 = vld [vmem:[#allocation5 + $0x6f8] sm:$0xff] }
 0x112   :  { %2040 = vmatprep.subr.bf16.mxu0 %v2039_v25  ;;  %v253_v18 = vadd.f32 %v1475_v8, %v186_v30  ;;  %vm272_vm6 = vcmp.eq.s32.totalorder %v2515_v31, %v3324_v13  ;;  %v2079_v34 = vpack.c.bf16 %v841_v4, %v840_v63  ;;  %v2049_v35 = vpack.c.bf16 %v793_v5, %v792_v11  ;;  %v828_v41 = vld [vmem:[#allocation5 + $0x760] sm:$0xff]  ;;  %v829_v2 = vld [vmem:[#allocation5 + $0x768] sm:$0xff]  ;;  %v846_v21 = vld [vmem:[#allocation5 + $0x7f0] sm:$0xff] }
 0x113   :  { %2070 = vmatpush3.bf16.msra.mxu1 %v2069_v15  ;;  %v2051_v52 = vpack.c.bf16 %v811_v24, %v810_v1  ;;  %vm339_vm7 = vcmp.eq.s32.totalorder %v2545_v55, %v3324_v13  ;;  %v1477_v61 = vsel %vm207_vm5, 1.0, %v2206_v22  ;;  %v1491_v46 = vsel %vm272_vm6, 1.0, %v2206_v22  ;;  %v845_v15 = vld [vmem:[#allocation5 + $0x7e8] sm:$0xff]  ;;  %v847_v30 = vld [vmem:[#allocation5 + $0x7f8] sm:$0xff]  ;;  %v798_v26 = vld [vmem:[#allocation5 + $0x670] sm:$0xff] }
 0x114   :  { %2072 = vmatprep.subr.bf16.mxu1 %v2071_v9  ;;  %v255_v16 = vadd.f32 %v1477_v61, %v188_v40  ;;  %vm274_vm8 = vcmp.eq.s32.totalorder %v2515_v31, %v3329_v57  ;;  %v2081_v27 = vpack.c.bf16 %v825_v44, %v824_v50  ;;  %v320_v0 = vadd.f32 %v1491_v46, %v253_v18  ;;  %v796_v9 = vld [vmem:[#allocation5 + $0x660] sm:$0xff]  ;;  %v830_v4 = vld [vmem:[#allocation5 + $0x770] sm:$0xff]  ;;  %v831_v11 = vld [vmem:[#allocation5 + $0x778] sm:$0xff] }
 0x115   :  { %2042 = vmatpush3.bf16.msra.mxu0 %v2041_v6  ;;  %v2083_v25 = vpack.c.bf16 %v843_v37, %v842_v60  ;;  %v2053_v58 = vpack.c.bf16 %v795_v23, %v794_v29  ;;  %v1507_v20 = vsel %vm339_vm7, 1.0, %v2206_v22  ;;  %vm341_vm9 = vcmp.eq.s32.totalorder %v2545_v55, %v3329_v57  ;;  %v797_v6 = vld [vmem:[#allocation5 + $0x668] sm:$0xff] }
 0x116   :  { %2044 = vmatprep.subr.bf16.mxu0 %v2043_v48  ;;  %v2055_v59 = vpack.c.bf16 %v813_v7, %v812_v62  ;;  %vm406_vm10 = vcmp.eq.s32.totalorder %v2547_v3, %v3324_v13  ;;  %v1493_v28 = vsel %vm274_vm8, 1.0, %v2206_v22  ;;  %v2085_v48 = vpack.c.bf16 %v827_v53, %v826_v33 }
 0x117   :  { %2074 = vmatpush3.bf16.msra.mxu1 %v2073_v56  ;;  %v322_v42 = vadd.f32 %v1493_v28, %v255_v16  ;;  %v387_v43 = vadd.f32 %v1507_v20, %v320_v0  ;;  %v1509_v55 = vsel %vm341_vm9, 1.0, %v2206_v22  ;;  %v2087_v10 = vpack.c.bf16 %v845_v15, %v844_v14 }
 0x118   :  { %2076 = vmatprep.subr.bf16.mxu1 %v2075_v49  ;;  %v2057_v17 = vpack.c.bf16 %v797_v6, %v796_v9  ;;  %v1523_v31 = vsel %vm406_vm10, 1.0, %v2206_v22  ;;  %vm408_vm11 = vcmp.eq.s32.totalorder %v2547_v3, %v3329_v57  ;;  %v2059_v56 = vpack.c.bf16 %v815_v36, %v814_v19  ;;  %v799_v49 = vld [vmem:[#allocation5 + $0x678] sm:$0xff] }
 0x119   :  { %2046 = vmatpush3.bf16.msra.mxu0 %v2045_v45  ;;  %vm473_vm12 = vcmp.eq.s32.totalorder %v2569_v38, %v3324_v13  ;;  %v389_v45 = vadd.f32 %v1509_v55, %v322_v42  ;;  %v2089_v51 = vpack.c.bf16 %v829_v2, %v828_v41  ;;  %v454_v39 = vadd.f32 %v1523_v31, %v387_v43 }
 0x11a   :  { %2048 = vmatprep.subr.bf16.mxu0 %v2047_v12  ;;  %vm540_vm13 = vcmp.eq.s32.totalorder %v2591_v47, %v3324_v13  ;;  %v1525_v63 = vsel %vm408_vm11, 1.0, %v2206_v22  ;;  %v2091_v3 = vpack.c.bf16 %v847_v30, %v846_v21  ;;  %v2061_v12 = vpack.c.bf16 %v799_v49, %v798_v26 }
 0x11b   :  { %2078 = vmatpush3.bf16.msra.mxu1 %v2077_v54  ;;  %v1539_v5 = vsel %vm473_vm12, 1.0, %v2206_v22  ;;  %vm475_vm14 = vcmp.eq.s32.totalorder %v2569_v38, %v3329_v57  ;;  %v1555_v32 = vsel %vm540_vm13, 1.0, %v2206_v22  ;;  %v456_v1 = vadd.f32 %v1525_v63, %v389_v45 }
 0x11c   :  { %2080 = vmatprep.subr.bf16.mxu1 %v2079_v34  ;;  %vm542_vm15 = vcmp.eq.s32.totalorder %v2591_v47, %v3329_v57  ;;  %v2093_v13 = vpack.c.bf16 %v831_v11, %v830_v4  ;;  %v521_v24 = vadd.f32 %v1539_v5, %v454_v39  ;;  %v1541_v8 = vsel %vm475_vm14, 1.0, %v2206_v22 }
 0x11d   :  { %2050 = vmatpush3.bf16.msra.mxu0 %v2049_v35  ;;  %v1557_v54 = vsel %vm542_vm15, 1.0, %v2206_v22  ;;  %v523_v18 = vadd.f32 %v1541_v8, %v456_v1 }
 0x11e   :  { %2052 = vmatprep.subr.bf16.mxu0 %v2051_v52  ;;  %v588_v40 = vadd.f32 %v1555_v32, %v521_v24 }
 0x11f   :  { %2082 = vmatpush3.bf16.msra.mxu1 %v2081_v27  ;;  %v590_v38 = vadd.f32 %v1557_v54, %v523_v18 }
 0x120   :  { %2084 = vmatprep.subr.bf16.mxu1 %v2083_v25 }
 0x121   :  { %2054 = vmatpush3.bf16.msra.mxu0 %v2053_v58 }
 0x122   :  { %2056 = vmatprep.subr.bf16.mxu0 %v2055_v59 }
 0x123   :  { %2086 = vmatpush3.bf16.msra.mxu1 %v2085_v48 }
 0x124   :  { %2088 = vmatprep.subr.bf16.mxu1 %v2087_v10 }
 0x125   :  { %2058 = vmatpush3.bf16.msra.mxu0 %v2057_v17 }
 0x126   :  { %2060 = vmatprep.subr.bf16.mxu0 %v2059_v56 }
 0x127   :  { %2090 = vmatpush3.bf16.msra.mxu1 %v2089_v51 }
 0x128   :  { %2092 = vmatprep.subr.bf16.mxu1 %v2091_v3 }
 0x129   :  { %2062 = vmatpush3.bf16.msra.mxu0 %v2061_v12 }
 0x12b   :  { %2094 = vmatpush3.bf16.msra.mxu1 %v2093_v13 }
 0x12c   :  { %1333 = vmatmul.mubr.f32.vlgmr.msra.gmra.mrb[6].mxu0 %v588_v40 }
 0x12e   :  { %1403 = vmatmul.mubr.f32.vlgmr.msra.gmra.mrb[6].mxu1 %v590_v38 }
 0x194   :  { %v1591_v34 = vpop.f32.mrb[0].mxu0 }
 0x195   :  { %v1592_v35 = vpop.f32.mrb[1].mxu0 }
 0x196   :  { %v1593_v50 = vadd.f32 %v1592_v35, %v1591_v34 }
 0x198   :  { %v1626_v44 = vpop.f32.mrb[0].mxu1 }
 0x199   :  { %v1627_v47 = vpop.f32.mrb[1].mxu1 }
 0x19a   :  { %v1628_v57 = vadd.f32 %v1627_v47, %v1626_v44 }
 0x19c   :  { %v985_v60 = vadd.f32 %v1628_v57, %v1593_v50 }
 0x1bc   :  { %v1661_v52 = vpop.f32.mrb[2].mxu0 }
 0x1bd   :  { %v1662_v37 = vpop.f32.mrb[3].mxu0 }
 0x1be   :  { %v1663_v29 = vadd.f32 %v1662_v37, %v1661_v52 }
 0x1c0   :  { %v1055_v61 = vadd.f32 %v1663_v29, %v985_v60 }
 0x1c1   :  { %v1696_v23 = vpop.f32.mrb[2].mxu1 }
 0x1c2   :  { %v1697_v62 = vpop.f32.mrb[3].mxu1 }
 0x1c3   :  { %v1698_v7 = vadd.f32 %v1697_v62, %v1696_v23 }
 0x1c5   :  { %v1125_v22 = vadd.f32 %v1698_v7, %v1055_v61 }
 0x1df   :  { %v1731_v46 = vpop.f32.mrb[4].mxu0 }
 0x1e0   :  { %v1732_v16 = vpop.f32.mrb[5].mxu0 }
 0x1e1   :  { %v1733_v27 = vadd.f32 %v1732_v16, %v1731_v46  ;;  %v1766_v0 = vpop.f32.mrb[4].mxu1 }
 0x1e2   :  { %v1767_v58 = vpop.f32.mrb[5].mxu1 }
 0x1e3   :  { %v1195_v25 = vadd.f32 %v1733_v27, %v1125_v22  ;;  %v1768_v33 = vadd.f32 %v1767_v58, %v1766_v0 }
 0x1e5   :  { %v1265_v53 = vadd.f32 %v1768_v33, %v1195_v25 }
 0x1ff   :  { %v1801_v14 = vpop.f32.mrb[6].mxu0 }
 0x200   :  { %v1802_v20 = vpop.f32.mrb[7].mxu0 }
 0x201   :  { %v1803_v59 = vadd.f32 %v1802_v20, %v1801_v14  ;;  %v1836_v15 = vpop.f32.mrb[6].mxu1 }
 0x202   :  { %v1837_v6 = vpop.f32.mrb[7].mxu1 }
 0x203   :  { %v1335_v9 = vadd.f32 %v1803_v59, %v1265_v53  ;;  %v1838_v28 = vadd.f32 %v1837_v6, %v1836_v15 }
 0x205   :  { %v1405_v19 = vadd.f32 %v1838_v28, %v1335_v9 }
 0x207   :  { %v1408_v36 = vmul.f32 0.0065789474, %v1405_v19 }
 0x209   :  { %v1409_v42 = vsub.f32 0.0, %v1408_v36 }
 0x20b   :  { %v1410_v48 = vmul.f32 1.442695, %v1409_v42 }
 0x20d   :  { %2118 = vpow2.f32 %v1410_v48 }
 0x217   :  { %v2119_v43 = vpop.eup %2118 }
 0x218   :  { %v1412_v55 = vadd.f32 1.0, %v2119_v43 }
 0x21a   :  { %2120 = vrcp.f32 %v1412_v55 }
 0x224   :  { %v2121_v10 = vpop.eup %2120 }
 0x225   :  { %1414 = vst [vmem:[#allocation7] sm:$0xff] %v2121_v10 }
 0x226   :  { %2177 = shalt.err (!%p2174_p6)
}
 0x227   :  { %s2178_s10 = scalar_lea.hbm %s3418_s2, 128 }
 0x228   :  { %p2179_p7 = scmp.ne.s32.totalorder %s3418_s2, %s2178_s10  ;;  %p2182_p8 = scmp.lt.u32.totalorder %s2178_s10, %s3418_s2 }
 0x22a   :  { %p2184_p9 = pnand %p2182_p8, %p2179_p7 }
 0x22c   :  { %2187 = shalt.err (!%p2184_p9)
}
 0x22d   :  { %1424 = dma.vmem_to_hbm [thread:$0]  %s1422_s6, 128, %s3418_s2, [#allocation4]  }
 0x22e   :  { %2192 = dma.done.wait [#allocation4], 128  }
 0x22f   :  { %2193 = vsyncadd [#allocation4], 4294967168 }
 0x230   :  { %1428 = vsyncpa [#allocation3], 1 }
 0x231   :  { %1429 = vsyncpa [#allocation6], 1 }
 0x232   :  { %1430 = vsyncpa [#allocation4], 1 }

</bundles_post_ra>
